<compile_context>
chip_gen: v7x
topology: tpu7x:2x2x1
jax: 0.10.0
libtpu: 0.0.40
codegen_flags: <defaults>
</compile_context>

<pallas_src>
import jax
import jax.numpy as jnp
from jax.experimental import pallas as pl
from jax.experimental.pallas import tpu as pltpu

EPS = 1e-5  # nn.LayerNorm default eps


# ------------------------------- kernel -------------------------------------

def _layernorm(x, gamma, beta):
    mu = jnp.mean(x, axis=-1, keepdims=True)
    xc = x - mu
    var = jnp.mean(xc * xc, axis=-1, keepdims=True)
    return xc * jax.lax.rsqrt(var + EPS) * gamma + beta


def _attn_kernel(x_ref, g_ref, b_ref, wq_ref, wk_ref, wv_ref,
                 nk_ref, nv_ref, wo_ref, o_ref):
    # x_ref: (1, N, D) f32 ; gamma/beta: (1, D) f32
    # wq/wk/wv: (H, D, Dh) bf16 (wq pre-scaled) ; nk/nv: (H, NKV, Dh) bf16
    # wo: (H, Dh, D) bf16 ; o_ref: (1, N, D) f32
    _, n, d = x_ref.shape
    h = wq_ref.shape[0]

    x = x_ref[0]                                   # (N, D) f32  (pre-norm: used for K/V)
    xn = _layernorm(x, g_ref[0], b_ref[0])         # (N, D) f32  (queries only, per spec)

    # bf16 MXU operands, f32 accumulation; head axis is the batch dim of every matmul.
    q_in = jnp.broadcast_to(xn.astype(jnp.bfloat16)[None], (h, n, d))
    kv_in = jnp.broadcast_to(x.astype(jnp.bfloat16)[None], (h, n, d))

    q = jnp.einsum("hnd,hde->hne", q_in, wq_ref[...],
                   preferred_element_type=jnp.float32)              # (H, N, Dh), scaled
    k = jnp.einsum("hnd,hde->hne", kv_in, wk_ref[...],
                   preferred_element_type=jnp.float32)              # (H, N, Dh)
    v = jnp.einsum("hnd,hde->hne", kv_in, wv_ref[...],
                   preferred_element_type=jnp.float32)              # (H, N, Dh)

    qb = q.astype(jnp.bfloat16)
    sim = jnp.einsum("hne,hme->hnm", qb, k.astype(jnp.bfloat16),
                     preferred_element_type=jnp.float32)            # (H, N, N)
    nsim = jnp.einsum("hne,hke->hnk", qb, nk_ref[...],
                      preferred_element_type=jnp.float32)           # (H, N, NKV)

    # softmax over the [null | seq] concatenation, without materializing a concat
    m = jnp.maximum(jnp.max(sim, axis=-1, keepdims=True),
                    jnp.max(nsim, axis=-1, keepdims=True))
    es = jnp.exp(sim - m)
    en = jnp.exp(nsim - m)
    denom = jnp.sum(es, axis=-1, keepdims=True) + jnp.sum(en, axis=-1, keepdims=True)
    inv = pl.reciprocal(denom, approx=True)

    o = jnp.einsum("hnm,hme->hne", es.astype(jnp.bfloat16), v.astype(jnp.bfloat16),
                   preferred_element_type=jnp.float32)
    o = o + jnp.einsum("hnk,hke->hne", en.astype(jnp.bfloat16), nv_ref[...],
                       preferred_element_type=jnp.float32)
    o = o * inv                                                     # (H, N, Dh) f32

    # output projection: per-head (N,Dh)x(Dh,D) batched over H, then sum over heads
    proj = jnp.einsum("hne,hed->hnd", o.astype(jnp.bfloat16), wo_ref[...],
                      preferred_element_type=jnp.float32)           # (H, N, D)
    o_ref[0] = jnp.sum(proj, axis=0).astype(o_ref.dtype)


# ----------------------------- pallas wrapper --------------------------------

def _const_map(ndim):
    def _m(b):
        return (0,) * ndim
    return _m


def _prep_kernel_params(p, *, heads, dim_head):
    """Reshape / cast the module parameters into the kernel's head-batched layouts."""
    dim = p["gamma"].shape[0]
    scale = dim_head ** (-0.5)

    def per_head_in(w):                           # (D, H*Dh) -> (H, D, Dh), bf16
        return w.reshape(dim, heads, dim_head).transpose(1, 0, 2).astype(jnp.bfloat16)

    return dict(
        gamma=p["gamma"].reshape(1, dim),
        beta=p["beta"].reshape(1, dim),
        wq=per_head_in(p["wq"] * scale),          # fold q-scale into the weight
        wk=per_head_in(p["wk"]),
        wv=per_head_in(p["wv"]),
        nk=p["null_kv"][:, 0::2, :].astype(jnp.bfloat16),   # 'h (n r) d', r=2 -> unbind
        nv=p["null_kv"][:, 1::2, :].astype(jnp.bfloat16),
        wo=p["wo"].reshape(heads, dim_head, dim).astype(jnp.bfloat16),  # (H*Dh,D)->(H,Dh,D)
    )


def attention_forward(x, params, *, heads, dim_head):
    B, N, D = x.shape
    kp = _prep_kernel_params(params, heads=heads, dim_head=dim_head)
    ops = [kp[k] for k in ("gamma", "beta", "wq", "wk", "wv", "nk", "nv", "wo")]

    x_spec = pl.BlockSpec((1, N, D), lambda b: (b, 0, 0))
    w_specs = [pl.BlockSpec(p.shape, _const_map(p.ndim)) for p in ops]

    return pl.pallas_call(
        _attn_kernel,
        out_shape=jax.ShapeDtypeStruct((B, N, D), x.dtype),
        grid=(B,),
        in_specs=[x_spec] + w_specs,
        out_specs=x_spec,
        compiler_params=pltpu.CompilerParams(
            dimension_semantics=("parallel",),
            vmem_limit_bytes=32 * 1024 * 1024),
    )(x, *ops)


# ------------------------- params & pure-JAX reference -----------------------

def init_params(key, *, dim, dim_head, heads, num_null_kv):
    inner = dim_head * heads
    k1, k2, k3, k4, k5 = jax.random.split(key, 5)

    def w(k, shape, fan_in):
        v = jax.random.normal(k, shape, jnp.float32) * (fan_in ** -0.5)
        # keep model weights exactly bf16-representable so the bf16 kernel and the
        # f32 reference see bit-identical parameter values
        return v.astype(jnp.bfloat16).astype(jnp.float32)

    return {
        "gamma": jnp.ones((dim,), jnp.float32),    # nn.LayerNorm default init
        "beta": jnp.zeros((dim,), jnp.float32),
        "wq": w(k1, (dim, inner), dim),
        "wk": w(k2, (dim, inner), dim),            # to_kv weight, first `inner` columns
        "wv": w(k3, (dim, inner), dim),            # to_kv weight, last  `inner` columns
        "null_kv": jax.random.normal(k4, (heads, 2 * num_null_kv, dim_head),
                                     jnp.float32).astype(jnp.bfloat16).astype(jnp.float32),
        "wo": w(k5, (inner, dim), inner),
    }


def reference_forward(x, p, *, heads, dim_head):
    """Pure-JAX f32 mirror of the PyTorch Attention.forward."""
    B, N, D = x.shape
    inner = heads * dim_head
    scale = dim_head ** (-0.5)

    mu = x.mean(-1, keepdims=True)
    var = ((x - mu) ** 2).mean(-1, keepdims=True)
    xn = (x - mu) / jnp.sqrt(var + EPS) * p["gamma"] + p["beta"]

    q = xn @ p["wq"]                 # queries from LayerNorm(x)
    k = x @ p["wk"]                  # keys/values from the *pre-norm* x (kv_input binds first)
    v = x @ p["wv"]

    sh = lambda t: t.reshape(B, N, heads, dim_head).transpose(0, 2, 1, 3)
    q, k, v = sh(q) * scale, sh(k), sh(v)

    nkv = p["null_kv"].shape[1] // 2
    nk = jnp.broadcast_to(p["null_kv"][:, 0::2, :], (B, heads, nkv, dim_head))
    nv = jnp.broadcast_to(p["null_kv"][:, 1::2, :], (B, heads, nkv, dim_head))
    k = jnp.concatenate([nk, k], axis=2)
    v = jnp.concatenate([nv, v], axis=2)

    sim = jnp.einsum("bhid,bhjd->bhij", q, k)
    attn = jax.nn.softmax(sim, axis=-1)
    out = jnp.einsum("bhij,bhjd->bhid", attn, v)
    out = out.transpose(0, 2, 1, 3).reshape(B, N, inner)
    return out @ p["wo"]


# ----------------------------------- main -------------------------------------

if __name__ == "__main__":
    B, N = 2, 16
    DIM, DIM_HEAD, HEADS, NUM_NULL_KV = 128, 32, 4, 2   # inner = 128 -> lane-dense

    key = jax.random.PRNGKey(0)
    kx, kp = jax.random.split(key)
    x = jax.random.normal(kx, (B, N, DIM), jnp.float32)
    params = init_params(kp, dim=DIM, dim_head=DIM_HEAD, heads=HEADS,
                         num_null_kv=NUM_NULL_KV)

    out = attention_forward(x, params, heads=HEADS, dim_head=DIM_HEAD)
    out = jax.block_until_ready(out)

    ref = reference_forward(x, params, heads=HEADS, dim_head=DIM_HEAD)
    assert out.shape == (B, N, DIM)
    max_err = float(jnp.max(jnp.abs(out - ref)))
    # tolerance relaxed vs. a pure-f32 kernel because matmuls run with bf16 operands
    assert jnp.allclose(out, ref, atol=5e-2, rtol=5e-2), max_err

    print("KERNEL_OK")
</pallas_src>

<mosaic_0001>
module attributes {stable_mosaic.version = 11 : i64} {
  func.func @_attn_kernel(%arg0: i32, %arg1: memref<1x16x128xf32, #tpu.memory_space<vmem>>, %arg2: memref<1x128xf32, #tpu.memory_space<vmem>>, %arg3: memref<1x128xf32, #tpu.memory_space<vmem>>, %arg4: memref<4x128x32xbf16, #tpu.memory_space<vmem>>, %arg5: memref<4x128x32xbf16, #tpu.memory_space<vmem>>, %arg6: memref<4x128x32xbf16, #tpu.memory_space<vmem>>, %arg7: memref<4x2x32xbf16, #tpu.memory_space<vmem>>, %arg8: memref<4x2x32xbf16, #tpu.memory_space<vmem>>, %arg9: memref<4x32x128xbf16, #tpu.memory_space<vmem>>, %arg10: memref<1x16x128xf32, #tpu.memory_space<vmem>>) attributes {dimension_semantics = [#tpu.dimension_semantics<parallel>], iteration_bounds = array<i64: 2>, scalar_prefetch = 0 : i64, scratch_operands = 0 : i64, tpu.core_type = #tpu.core_type<tc>, window_params = [{transform_indices = @transform_0, window_bounds = array<i64: 1, 16, 128>}, {pipeline_mode = #tpu.pipeline_mode<synchronous>, transform_indices = @transform_1, window_bounds = array<i64: 1, 128>}, {pipeline_mode = #tpu.pipeline_mode<synchronous>, transform_indices = @transform_2, window_bounds = array<i64: 1, 128>}, {pipeline_mode = #tpu.pipeline_mode<synchronous>, transform_indices = @transform_3, window_bounds = array<i64: 4, 128, 32>}, {pipeline_mode = #tpu.pipeline_mode<synchronous>, transform_indices = @transform_4, window_bounds = array<i64: 4, 128, 32>}, {pipeline_mode = #tpu.pipeline_mode<synchronous>, transform_indices = @transform_5, window_bounds = array<i64: 4, 128, 32>}, {pipeline_mode = #tpu.pipeline_mode<synchronous>, transform_indices = @transform_6, window_bounds = array<i64: 4, 2, 32>}, {pipeline_mode = #tpu.pipeline_mode<synchronous>, transform_indices = @transform_7, window_bounds = array<i64: 4, 2, 32>}, {pipeline_mode = #tpu.pipeline_mode<synchronous>, transform_indices = @transform_8, window_bounds = array<i64: 4, 32, 128>}, {transform_indices = @transform_9, window_bounds = array<i64: 1, 16, 128>}]} {
    %c0 = arith.constant 0 : index
    %c0_0 = arith.constant 0 : index
    %c0_1 = arith.constant 0 : index
    %0 = vector.load %arg1[%c0, %c0_0, %c0_1] : memref<1x16x128xf32, #tpu.memory_space<vmem>>, vector<1x16x128xf32>
    %1 = vector.shape_cast %0 : vector<1x16x128xf32> to vector<16x128xf32>
    %c0_2 = arith.constant 0 : index
    %c0_3 = arith.constant 0 : index
    %2 = vector.load %arg2[%c0_2, %c0_3] : memref<1x128xf32, #tpu.memory_space<vmem>>, vector<1x128xf32>
    %3 = vector.shape_cast %2 : vector<1x128xf32> to vector<128xf32>
    %c0_4 = arith.constant 0 : index
    %c0_5 = arith.constant 0 : index
    %4 = vector.load %arg3[%c0_4, %c0_5] : memref<1x128xf32, #tpu.memory_space<vmem>>, vector<1x128xf32>
    %5 = vector.shape_cast %4 : vector<1x128xf32> to vector<128xf32>
    %cst = arith.constant dense<0.000000e+00> : vector<16xf32>
    %6 = vector.multi_reduction <add>, %1, %cst [1] : vector<16x128xf32> to vector<16xf32>
    %7 = vector.shape_cast %6 : vector<16xf32> to vector<16x1xf32>
    %cst_6 = arith.constant 1.280000e+02 : f32
    %8 = vector.broadcast %cst_6 : f32 to vector<16x1xf32>
    %9 = arith.divf %7, %8 : vector<16x1xf32>
    %10 = vector.broadcast %9 : vector<16x1xf32> to vector<16x128xf32>
    %11 = arith.subf %1, %10 : vector<16x128xf32>
    %12 = arith.mulf %11, %11 : vector<16x128xf32>
    %cst_7 = arith.constant dense<0.000000e+00> : vector<16xf32>
    %13 = vector.multi_reduction <add>, %12, %cst_7 [1] : vector<16x128xf32> to vector<16xf32>
    %14 = vector.shape_cast %13 : vector<16xf32> to vector<16x1xf32>
    %cst_8 = arith.constant 1.280000e+02 : f32
    %15 = vector.broadcast %cst_8 : f32 to vector<16x1xf32>
    %16 = arith.divf %14, %15 : vector<16x1xf32>
    %cst_9 = arith.constant 9.99999974E-6 : f32
    %17 = vector.broadcast %cst_9 : f32 to vector<16x1xf32>
    %18 = arith.addf %16, %17 : vector<16x1xf32>
    %19 = math.rsqrt %18 : vector<16x1xf32>
    %20 = vector.broadcast %19 : vector<16x1xf32> to vector<16x128xf32>
    %21 = arith.mulf %11, %20 : vector<16x128xf32>
    %22 = vector.shape_cast %3 : vector<128xf32> to vector<1x128xf32>
    %23 = vector.broadcast %22 : vector<1x128xf32> to vector<16x128xf32>
    %24 = arith.mulf %21, %23 : vector<16x128xf32>
    %25 = vector.shape_cast %5 : vector<128xf32> to vector<1x128xf32>
    %26 = vector.broadcast %25 : vector<1x128xf32> to vector<16x128xf32>
    %27 = arith.addf %24, %26 : vector<16x128xf32>
    %28 = arith.truncf %27 : vector<16x128xf32> to vector<16x128xbf16>
    %29 = vector.shape_cast %28 : vector<16x128xbf16> to vector<1x16x128xbf16>
    %30 = vector.shape_cast %29 : vector<1x16x128xbf16> to vector<1x16x128xbf16>
    %31 = vector.broadcast %30 : vector<1x16x128xbf16> to vector<4x16x128xbf16>
    %32 = arith.truncf %1 : vector<16x128xf32> to vector<16x128xbf16>
    %33 = vector.shape_cast %32 : vector<16x128xbf16> to vector<1x16x128xbf16>
    %34 = vector.shape_cast %33 : vector<1x16x128xbf16> to vector<1x16x128xbf16>
    %35 = vector.broadcast %34 : vector<1x16x128xbf16> to vector<4x16x128xbf16>
    %c0_10 = arith.constant 0 : index
    %c0_11 = arith.constant 0 : index
    %c0_12 = arith.constant 0 : index
    %36 = vector.load %arg4[%c0_10, %c0_11, %c0_12] : memref<4x128x32xbf16, #tpu.memory_space<vmem>>, vector<4x128x32xbf16>
    "tpu.trace_start"() <{level = 10 : i32, message = "hnd,hde->hne"}> : () -> ()
    %cst_13 = arith.constant dense<0.000000e+00> : vector<4x16x32xf32>
    %37 = tpu.matmul %31, %36, %cst_13 {dimension_numbers = #tpu.dot_dimension_numbers<[2], [1], [1], [2], [0, 0, 0, 1, 1, 2], [0], [0]>} : vector<4x16x128xbf16>, vector<4x128x32xbf16>, vector<4x16x32xf32> -> vector<4x16x32xf32>
    "tpu.trace_stop"() : () -> ()
    %c0_14 = arith.constant 0 : index
    %c0_15 = arith.constant 0 : index
    %c0_16 = arith.constant 0 : index
    %38 = vector.load %arg5[%c0_14, %c0_15, %c0_16] : memref<4x128x32xbf16, #tpu.memory_space<vmem>>, vector<4x128x32xbf16>
    "tpu.trace_start"() <{level = 10 : i32, message = "hnd,hde->hne"}> : () -> ()
    %cst_17 = arith.constant dense<0.000000e+00> : vector<4x16x32xf32>
    %39 = tpu.matmul %35, %38, %cst_17 {dimension_numbers = #tpu.dot_dimension_numbers<[2], [1], [1], [2], [0, 0, 0, 1, 1, 2], [0], [0]>} : vector<4x16x128xbf16>, vector<4x128x32xbf16>, vector<4x16x32xf32> -> vector<4x16x32xf32>
    "tpu.trace_stop"() : () -> ()
    %c0_18 = arith.constant 0 : index
    %c0_19 = arith.constant 0 : index
    %c0_20 = arith.constant 0 : index
    %40 = vector.load %arg6[%c0_18, %c0_19, %c0_20] : memref<4x128x32xbf16, #tpu.memory_space<vmem>>, vector<4x128x32xbf16>
    "tpu.trace_start"() <{level = 10 : i32, message = "hnd,hde->hne"}> : () -> ()
    %cst_21 = arith.constant dense<0.000000e+00> : vector<4x16x32xf32>
    %41 = tpu.matmul %35, %40, %cst_21 {dimension_numbers = #tpu.dot_dimension_numbers<[2], [1], [1], [2], [0, 0, 0, 1, 1, 2], [0], [0]>} : vector<4x16x128xbf16>, vector<4x128x32xbf16>, vector<4x16x32xf32> -> vector<4x16x32xf32>
    "tpu.trace_stop"() : () -> ()
    %42 = arith.truncf %37 : vector<4x16x32xf32> to vector<4x16x32xbf16>
    %43 = arith.truncf %39 : vector<4x16x32xf32> to vector<4x16x32xbf16>
    "tpu.trace_start"() <{level = 10 : i32, message = "hne,hme->hnm"}> : () -> ()
    %cst_22 = arith.constant dense<0.000000e+00> : vector<4x16x16xf32>
    %44 = tpu.matmul %42, %43, %cst_22 {dimension_numbers = #tpu.dot_dimension_numbers<[2], [2], [1], [1], [0, 0, 0, 1, 1, 1], [0], [0]>} : vector<4x16x32xbf16>, vector<4x16x32xbf16>, vector<4x16x16xf32> -> vector<4x16x16xf32>
    "tpu.trace_stop"() : () -> ()
    %c0_23 = arith.constant 0 : index
    %c0_24 = arith.constant 0 : index
    %c0_25 = arith.constant 0 : index
    %45 = vector.load %arg7[%c0_23, %c0_24, %c0_25] : memref<4x2x32xbf16, #tpu.memory_space<vmem>>, vector<4x2x32xbf16>
    "tpu.trace_start"() <{level = 10 : i32, message = "hne,hke->hnk"}> : () -> ()
    %cst_26 = arith.constant dense<0.000000e+00> : vector<4x16x2xf32>
    %46 = tpu.matmul %42, %45, %cst_26 {dimension_numbers = #tpu.dot_dimension_numbers<[2], [2], [1], [1], [0, 0, 0, 1, 1, 1], [0], [0]>} : vector<4x16x32xbf16>, vector<4x2x32xbf16>, vector<4x16x2xf32> -> vector<4x16x2xf32>
    "tpu.trace_stop"() : () -> ()
    %cst_27 = arith.constant dense<0xFF800000> : vector<4x16xf32>
    %47 = vector.multi_reduction <maximumf>, %44, %cst_27 [2] : vector<4x16x16xf32> to vector<4x16xf32>
    %48 = vector.shape_cast %47 : vector<4x16xf32> to vector<4x16x1xf32>
    %cst_28 = arith.constant dense<0xFF800000> : vector<4x16xf32>
    %49 = vector.multi_reduction <maximumf>, %46, %cst_28 [2] : vector<4x16x2xf32> to vector<4x16xf32>
    %50 = vector.shape_cast %49 : vector<4x16xf32> to vector<4x16x1xf32>
    %51 = arith.maximumf %48, %50 : vector<4x16x1xf32>
    %52 = vector.broadcast %51 : vector<4x16x1xf32> to vector<4x16x16xf32>
    %53 = arith.subf %44, %52 : vector<4x16x16xf32>
    %54 = math.exp %53 : vector<4x16x16xf32>
    %55 = vector.broadcast %51 : vector<4x16x1xf32> to vector<4x16x2xf32>
    %56 = arith.subf %46, %55 : vector<4x16x2xf32>
    %57 = math.exp %56 : vector<4x16x2xf32>
    %cst_29 = arith.constant dense<0.000000e+00> : vector<4x16xf32>
    %58 = vector.multi_reduction <add>, %54, %cst_29 [2] : vector<4x16x16xf32> to vector<4x16xf32>
    %59 = vector.shape_cast %58 : vector<4x16xf32> to vector<4x16x1xf32>
    %cst_30 = arith.constant dense<0.000000e+00> : vector<4x16xf32>
    %60 = vector.multi_reduction <add>, %57, %cst_30 [2] : vector<4x16x2xf32> to vector<4x16xf32>
    %61 = vector.shape_cast %60 : vector<4x16xf32> to vector<4x16x1xf32>
    %62 = arith.addf %59, %61 : vector<4x16x1xf32>
    %63 = tpu.reciprocal %62 {approx = true} : vector<4x16x1xf32> -> vector<4x16x1xf32>
    %64 = arith.truncf %54 : vector<4x16x16xf32> to vector<4x16x16xbf16>
    %65 = arith.truncf %41 : vector<4x16x32xf32> to vector<4x16x32xbf16>
    "tpu.trace_start"() <{level = 10 : i32, message = "hnm,hme->hne"}> : () -> ()
    %cst_31 = arith.constant dense<0.000000e+00> : vector<4x16x32xf32>
    %66 = tpu.matmul %64, %65, %cst_31 {dimension_numbers = #tpu.dot_dimension_numbers<[2], [1], [1], [2], [0, 0, 0, 1, 1, 2], [0], [0]>} : vector<4x16x16xbf16>, vector<4x16x32xbf16>, vector<4x16x32xf32> -> vector<4x16x32xf32>
    "tpu.trace_stop"() : () -> ()
    %67 = arith.truncf %57 : vector<4x16x2xf32> to vector<4x16x2xbf16>
    %c0_32 = arith.constant 0 : index
    %c0_33 = arith.constant 0 : index
    %c0_34 = arith.constant 0 : index
    %68 = vector.load %arg8[%c0_32, %c0_33, %c0_34] : memref<4x2x32xbf16, #tpu.memory_space<vmem>>, vector<4x2x32xbf16>
    "tpu.trace_start"() <{level = 10 : i32, message = "hnk,hke->hne"}> : () -> ()
    %cst_35 = arith.constant dense<0.000000e+00> : vector<4x16x32xf32>
    %69 = tpu.matmul %67, %68, %cst_35 {dimension_numbers = #tpu.dot_dimension_numbers<[2], [1], [1], [2], [0, 0, 0, 1, 1, 2], [0], [0]>} : vector<4x16x2xbf16>, vector<4x2x32xbf16>, vector<4x16x32xf32> -> vector<4x16x32xf32>
    "tpu.trace_stop"() : () -> ()
    %70 = arith.addf %66, %69 : vector<4x16x32xf32>
    %71 = vector.broadcast %63 : vector<4x16x1xf32> to vector<4x16x32xf32>
    %72 = arith.mulf %70, %71 : vector<4x16x32xf32>
    %73 = arith.truncf %72 : vector<4x16x32xf32> to vector<4x16x32xbf16>
    %c0_36 = arith.constant 0 : index
    %c0_37 = arith.constant 0 : index
    %c0_38 = arith.constant 0 : index
    %74 = vector.load %arg9[%c0_36, %c0_37, %c0_38] : memref<4x32x128xbf16, #tpu.memory_space<vmem>>, vector<4x32x128xbf16>
    "tpu.trace_start"() <{level = 10 : i32, message = "hne,hed->hnd"}> : () -> ()
    %cst_39 = arith.constant dense<0.000000e+00> : vector<4x16x128xf32>
    %75 = tpu.matmul %73, %74, %cst_39 {dimension_numbers = #tpu.dot_dimension_numbers<[2], [1], [1], [2], [0, 0, 0, 1, 1, 2], [0], [0]>} : vector<4x16x32xbf16>, vector<4x32x128xbf16>, vector<4x16x128xf32> -> vector<4x16x128xf32>
    "tpu.trace_stop"() : () -> ()
    %cst_40 = arith.constant dense<0.000000e+00> : vector<16x128xf32>
    %76 = vector.multi_reduction <add>, %75, %cst_40 [0] : vector<4x16x128xf32> to vector<16x128xf32>
    %c0_41 = arith.constant 0 : index
    %c0_42 = arith.constant 0 : index
    %c0_43 = arith.constant 0 : index
    %77 = vector.load %arg10[%c0_41, %c0_42, %c0_43] : memref<1x16x128xf32, #tpu.memory_space<vmem>>, vector<1x16x128xf32>
    %78 = vector.shape_cast %77 : vector<1x16x128xf32> to vector<16x128xf32>
    %79 = vector.shape_cast %76 : vector<16x128xf32> to vector<1x16x128xf32>
    tpu.vector_store %arg10[%c0_41, %c0_42, %c0_43], %79 {strides = array<i32>} : memref<1x16x128xf32, #tpu.memory_space<vmem>>, vector<1x16x128xf32>,
    return
  }
  func.func @transform_0(%arg0: i32) -> (i32, i32, i32) {
    %c0_i32 = arith.constant 0 : i32
    %c0_i32_0 = arith.constant 0 : i32
    %c0_i32_1 = arith.constant 0 : i32
    return %arg0, %c0_i32, %c0_i32_0 : i32, i32, i32
  }
  func.func @transform_1(%arg0: i32) -> (i32, i32) {
    %c0_i32 = arith.constant 0 : i32
    %c0_i32_0 = arith.constant 0 : i32
    %c0_i32_1 = arith.constant 0 : i32
    return %c0_i32, %c0_i32_0 : i32, i32
  }
  func.func @transform_2(%arg0: i32) -> (i32, i32) {
    %c0_i32 = arith.constant 0 : i32
    %c0_i32_0 = arith.constant 0 : i32
    %c0_i32_1 = arith.constant 0 : i32
    return %c0_i32, %c0_i32_0 : i32, i32
  }
  func.func @transform_3(%arg0: i32) -> (i32, i32, i32) {
    %c0_i32 = arith.constant 0 : i32
    %c0_i32_0 = arith.constant 0 : i32
    %c0_i32_1 = arith.constant 0 : i32
    %c0_i32_2 = arith.constant 0 : i32
    return %c0_i32, %c0_i32_0, %c0_i32_1 : i32, i32, i32
  }
  func.func @transform_4(%arg0: i32) -> (i32, i32, i32) {
    %c0_i32 = arith.constant 0 : i32
    %c0_i32_0 = arith.constant 0 : i32
    %c0_i32_1 = arith.constant 0 : i32
    %c0_i32_2 = arith.constant 0 : i32
    return %c0_i32, %c0_i32_0, %c0_i32_1 : i32, i32, i32
  }
  func.func @transform_5(%arg0: i32) -> (i32, i32, i32) {
    %c0_i32 = arith.constant 0 : i32
    %c0_i32_0 = arith.constant 0 : i32
    %c0_i32_1 = arith.constant 0 : i32
    %c0_i32_2 = arith.constant 0 : i32
    return %c0_i32, %c0_i32_0, %c0_i32_1 : i32, i32, i32
  }
  func.func @transform_6(%arg0: i32) -> (i32, i32, i32) {
    %c0_i32 = arith.constant 0 : i32
    %c0_i32_0 = arith.constant 0 : i32
    %c0_i32_1 = arith.constant 0 : i32
    %c0_i32_2 = arith.constant 0 : i32
    return %c0_i32, %c0_i32_0, %c0_i32_1 : i32, i32, i32
  }
  func.func @transform_7(%arg0: i32) -> (i32, i32, i32) {
    %c0_i32 = arith.constant 0 : i32
    %c0_i32_0 = arith.constant 0 : i32
    %c0_i32_1 = arith.constant 0 : i32
    %c0_i32_2 = arith.constant 0 : i32
    return %c0_i32, %c0_i32_0, %c0_i32_1 : i32, i32, i32
  }
  func.func @transform_8(%arg0: i32) -> (i32, i32, i32) {
    %c0_i32 = arith.constant 0 : i32
    %c0_i32_0 = arith.constant 0 : i32
    %c0_i32_1 = arith.constant 0 : i32
    %c0_i32_2 = arith.constant 0 : i32
    return %c0_i32, %c0_i32_0, %c0_i32_1 : i32, i32, i32
  }
  func.func @transform_9(%arg0: i32) -> (i32, i32, i32) {
    %c0_i32 = arith.constant 0 : i32
    %c0_i32_0 = arith.constant 0 : i32
    %c0_i32_1 = arith.constant 0 : i32
    return %arg0, %c0_i32, %c0_i32_0 : i32, i32, i32
  }
}

</mosaic_0001>

<bundles_post_ra>
// kernel: tpu_custom_call.1
= control target key start
LH: loop header
LB: loop body
LE: loop exit
PB: predicated region body
PF: predicated region fallthrough
CT: control target
= control target key end

     0   :  { %14 = vsyncpa [#allocation3], 0  ;;  %s4755_s0 = inlined_call_operand.vmem [shape: f32[2,16,128], index: 0, kind: input, shape index: {}]   ;;  %s4756_s1 = inlined_call_operand.vmem [shape: f32[1,128], index: 1, kind: input, shape index: {}]   ;;  %s4757_s2 = inlined_call_operand.vmem [shape: f32[1,128], index: 2, kind: input, shape index: {}]   ;;  %s4758_s3 = inlined_call_operand.vmem [shape: bf16[4,128,32], index: 3, kind: input, shape index: {}]   ;;  %s4759_s4 = inlined_call_operand.vmem [shape: bf16[4,128,32], index: 4, kind: input, shape index: {}]   ;;  %s4760_s5 = inlined_call_operand.vmem [shape: bf16[4,128,32], index: 5, kind: input, shape index: {}]   ;;  %s4761_s6 = inlined_call_operand.vmem [shape: bf16[4,2,32], index: 6, kind: input, shape index: {}]   ;;  %s4762_s7 = inlined_call_operand.vmem [shape: bf16[4,2,32], index: 7, kind: input, shape index: {}]   ;;  %s4763_s8 = inlined_call_operand.vmem [shape: bf16[4,32,128], index: 8, kind: input, shape index: {}]   ;;  %s4764_s9 = inlined_call_operand.hbm [shape: f32[2,16,128], index: 9, kind: output, shape index: {}]  }
   0x1   :  { %16 = vsyncpa [#allocation3 + $0x1], 0  ;;  %s3907_s30 = smov 0   ;;  %s3909_s10 = smov 0  }
   0x2   :  { %s3911_s11 = smov 0   ;;  %s3913_s12 = smov 0  }
   0x3 LB: > { %s3928_s13 = sadd.s32 4294967295, %s3850_s12   ;;  %s2901_s14 = sadd.s32 4294967294, %s3850_s12   ;;  %s3850_s12 = sphi %s3913_s12, %s4770_s12   ;;  %s3846_s11 = sphi %s3911_s11, %s4769_s11   ;;  %s3842_s10 = sphi %s3909_s10, %s4768_s10   ;;  %s3838_s30 = sphi %s3907_s30, %s4767_s30  }
   0x4   : > { %s3932_s15 = sadd.s32 1, %s3850_s12   ;;  %s223_s16 = sadd.s32 1, %s3846_s11 }
   0x5   : > { %s220_s17 = ssub.s32 %s3850_s12, %s3932_s15  ;;  %p233_p0 = scmp.ne.s32.totalorder %s3846_s11, %s3842_s10 }
   0x6   : > { %p221_p1 = scmp.eq.s32.totalorder %s220_s17, 0  ;;  %p234_p2 = scmp.eq.s32.totalorder %s3928_s13, 1 }
   0x7   : > { %p239_p3 = scmp.ne.s32.totalorder %s3842_s10, %s3838_s30  ;;  %p240_p4 = scmp.eq.s32.totalorder %s2901_s14, 1 }
   0x8   : > { %s3943_s18 = scalar_select %p221_p1, %s3846_s11, %s223_s16  }
   0x9   : > { %p3945_p5 = por %p234_p2, %p233_p0  ;;  %p3949_p6 = por %p240_p4, %p239_p3 }
   0xa   : > { %p2904_p7 = scmp.ge.s32.totalorder %s3850_s12, 1  ;;  %p290_p8 = scmp.lt.s32.totalorder %s3850_s12, 3 }
   0xc   : > { %p291_p9 = pnand %p2904_p7, %p290_p8 }
   0xd   : > { %p326_p10 = scmp.lt.s32.totalorder (!%p291_p9), %s3928_s13, 1  ;;  %v3632_v2 = vld [vmem:[%s4758_s3] sm:$0xff] (!%p291_p9)   ;;  %v3634_v4 = vld [vmem:[%s4758_s3 + $0x8] sm:$0xff] (!%p291_p9)   ;;  %v3852_v5 = vmov (!%p291_p9), 0.0   ;;  %v3636_v15 = vld [vmem:[%s4758_s3 + $0x10] sm:$0xff] (!%p291_p9)   ;;  %vm3853_vm0 = vmmov (!%p291_p9), 0  }
   0xe   : > { %294 = sbr.rel (%p291_p9) target bundleno = 1543 (0x607), region = 56  ;;  %v3633_v3 = vld [vmem:[%s4758_s3 + $0x40] sm:$0xff] (!%p291_p9)   ;;  %3193 = vmatprep.subr.bf16.mxu0 (!%p291_p9), %v3852_v5  ;;  %3213 = vmatprep.subr.bf16.mxu1 (!%p291_p9), %v3852_v5  ;;  %v3635_v6 = vld [vmem:[%s4758_s3 + $0x48] sm:$0xff] (!%p291_p9)   ;;  %v3637_v16 = vld [vmem:[%s4758_s3 + $0x50] sm:$0xff] (!%p291_p9)   ;;  %vm1645_vm1 = vcmask (!%p291_p9), 261120   ;;  %vm2039_vm2 = vcmask (!%p291_p9), 15360  }
   0xf   : > { %3194 = vmatpush3.bf16.msra.mxu0 (!%p291_p9), %v3632_v2  ;;  %3214 = vmatpush3.bf16.msra.mxu1 (!%p291_p9), %v3633_v3  ;;  %v3638_v17 = vld [vmem:[%s4758_s3 + $0x18] sm:$0xff] (!%p291_p9)   ;;  %v3640_v19 = vld [vmem:[%s4758_s3 + $0x20] sm:$0xff] (!%p291_p9)   ;;  %v3642_v21 = vld [vmem:[%s4758_s3 + $0x28] sm:$0xff] (!%p291_p9)   ;;  %vm2014_vm3 = vcmask (!%p291_p9), 130048   ;;  %vm2203_vm4 = vcmask (!%p291_p9), 1040384   ;;  %s323_s26 = sand.u32 (!%p291_p9), 1, %s3842_s10  }
  0x10   : > { %3195 = vmatprep.subr.bf16.mxu0 (!%p291_p9), %v3852_v5  ;;  %3215 = vmatprep.subr.bf16.mxu1 (!%p291_p9), %v3852_v5  ;;  %v3639_v18 = vld [vmem:[%s4758_s3 + $0x58] sm:$0xff] (!%p291_p9)   ;;  %v3641_v20 = vld [vmem:[%s4758_s3 + $0x60] sm:$0xff] (!%p291_p9)   ;;  %v3643_v22 = vld [vmem:[%s4758_s3 + $0x68] sm:$0xff] (!%p291_p9)   ;;  %s2905_s27 = sshll.u32 (!%p291_p9), %s323_s26, 4  ;;  %s3040_s14 = sshll.u32 (!%p291_p9), %s3928_s13, 8 }
  0x11   : > { %v3644_v23 = vld [vmem:[%s4758_s3 + $0x30] sm:$0xff] (!%p291_p9)   ;;  %v3646_v25 = vld [vmem:[%s4758_s3 + $0x38] sm:$0xff] (!%p291_p9)   ;;  %3209 = vmatprep.mubr.msk.bf16.mxu0 (!%p291_p9), %vm3853_vm0, %v3852_v5  ;;  %3229 = vmatprep.mubr.msk.bf16.mxu1 (!%p291_p9), %vm3853_vm0, %v3852_v5  ;;  %v2908_v35 = vld [vmem:[%s4756_s1] ss:$0 sm:$0xff] (!%p291_p9)  ;;  %s325_s28 = scalar_lea.vmem (!%p291_p9), [#allocation2], %s2905_s27 }
  0x12   : > { %v3645_v24 = vld [vmem:[%s4758_s3 + $0x70] sm:$0xff] (!%p291_p9)   ;;  %v3647_v26 = vld [vmem:[%s4758_s3 + $0x78] sm:$0xff] (!%p291_p9)   ;;  %v2909_v39 = vld [vmem:[%s4757_s2] ss:$0 sm:$0xff] (!%p291_p9)  ;;  %s2839_s29 = sshll.u32 (!%p291_p9), %s325_s28, 4  ;;  %s4707_s29 = int_to_ptr.vmem [resolvable:$true] %s2839_s29 }
  0x13   : > { %3196 = vmatpush3.bf16.msra.mxu0 (!%p291_p9), %v3634_v4  ;;  %3216 = vmatpush3.bf16.msra.mxu1 (!%p291_p9), %v3635_v6  ;;  %v3648_v43 = vld [vmem:[%s4758_s3 + $0x80] sm:$0xff] (!%p291_p9)   ;;  %v3650_v46 = vld [vmem:[%s4758_s3 + $0x88] sm:$0xff] (!%p291_p9)   ;;  %v3652_v48 = vld [vmem:[%s4758_s3 + $0x90] sm:$0xff] (!%p291_p9)   ;;  %s3788_s23 = scalar_lea.vmem (!%p291_p9), %s4707_s29, 256 }
  0x14   : > { %3197 = vmatprep.subr.bf16.mxu0 (!%p291_p9), %v3852_v5  ;;  %3217 = vmatprep.subr.bf16.mxu1 (!%p291_p9), %v3852_v5  ;;  %v3649_v44 = vld [vmem:[%s4758_s3 + $0xc0] sm:$0xff] (!%p291_p9)   ;;  %v3651_v47 = vld [vmem:[%s4758_s3 + $0xc8] sm:$0xff] (!%p291_p9)   ;;  %v3653_v49 = vld [vmem:[%s4758_s3 + $0xd0] sm:$0xff] (!%p291_p9)   ;;  %p3789_p11 = scmp.ne.s32.totalorder (!%p291_p9), %s4707_s29, %s3788_s23 }
  0x15   : > { %s327_s21 = scalar_select %p326_p10, %s3928_s13, 1  ;;  %v3654_v50 = vld [vmem:[%s4758_s3 + $0x98] sm:$0xff]   ;;  %v3656_v52 = vld [vmem:[%s4758_s3 + $0xa0] sm:$0xff]   ;;  %v3658_v54 = vld [vmem:[%s4758_s3 + $0xa8] sm:$0xff]  }
  0x16   : > { %v3655_v51 = vld [vmem:[%s4758_s3 + $0xd8] sm:$0xff]   ;;  %v3657_v53 = vld [vmem:[%s4758_s3 + $0xe0] sm:$0xff]   ;;  %v3659_v55 = vld [vmem:[%s4758_s3 + $0xe8] sm:$0xff]   ;;  %p3790_p12 = pnand %p3789_p11, %p3945_p5  ;;  %s3854_s13 = smov [#allocation2]  }
  0x17   : > { %s3039_s22 = sshll.u32 %s327_s21, 4  ;;  %3198 = vmatpush3.bf16.msra.mxu0 %v3636_v15  ;;  %3218 = vmatpush3.bf16.msra.mxu1 %v3637_v16  ;;  %v3660_v56 = vld [vmem:[%s4758_s3 + $0xb0] sm:$0xff]   ;;  %v3662_v58 = vld [vmem:[%s4758_s3 + $0xb8] sm:$0xff]   ;;  %v3664_v60 = vld [vmem:[%s4759_s4] sm:$0xff]   ;;  %s4712_s21 = scalar_lea.hbm %s4764_s9, %s3040_s14 }
  0x18   : > { %s330_s25 = scalar_lea.vmem %s4755_s0, %s3039_s22  ;;  %3199 = vmatprep.subr.bf16.mxu0 %v3852_v5  ;;  %3219 = vmatprep.subr.bf16.mxu1 %v3852_v5  ;;  %v3661_v57 = vld [vmem:[%s4758_s3 + $0xf0] sm:$0xff]   ;;  %v3663_v59 = vld [vmem:[%s4758_s3 + $0xf8] sm:$0xff]   ;;  %v3666_v61 = vld [vmem:[%s4759_s4 + $0x40] sm:$0xff]   ;;  %s4714_s22 = scalar_lea.sflag [#allocation3], %s323_s26 }
  0x19   : > { %v3960_v0 = vld [vmem:[%s330_s25] sm:$0xff]  ;;  %v3962_v1 = vld [vmem:[%s330_s25 + $0x8] sm:$0xff]  ;;  %v3667_v2 = vld [vmem:[%s4759_s4 + $0x10] sm:$0xff]   ;;  %p3791_p13 = pneg %p3790_p12  ;;  %s3792_s24 = sshll.u32 %s3854_s13, 4  ;;  %s3793_s24 = int_to_ptr.vmem [resolvable:$false] %s3792_s24 }
  0x1a   : > { %336 = vadd.xlane.f32.xlu0 %v3960_v0  ;;  %v3665_v62 = vld [vmem:[%s4759_s4 + $0x8] sm:$0xff]   ;;  %v3670_v3 = vld [vmem:[%s4759_s4 + $0x50] sm:$0xff]   ;;  %v3669_v4 = vld [vmem:[%s4759_s4 + $0x18] sm:$0xff]   ;;  %v4180_v15 = vpack.c.bf16 %v3962_v1, %v3960_v0  ;;  %s3794_s25 = scalar_lea.vmem %s3793_s24, 512  ;;  %p3795_p0 = scmp.lt.s32.totalorder %s4707_s29, %s3793_s24 }
  0x1b   : > { %3200 = vmatpush3.bf16.msra.mxu0 %v3638_v17  ;;  %3220 = vmatpush3.bf16.msra.mxu1 %v3639_v18  ;;  %v3668_v63 = vld [vmem:[%s4759_s4 + $0x48] sm:$0xff]   ;;  %v3672_v6 = vld [vmem:[%s4759_s4 + $0x58] sm:$0xff]   ;;  %v3679_v16 = vld [vmem:[%s4759_s4 + $0x80] sm:$0xff]   ;;  %p3796_p1 = scmp.lt.s32.totalorder %s3794_s25, %s3788_s23 }
  0x1c   : > { %3201 = vmatprep.subr.bf16.mxu0 %v3852_v5  ;;  %3221 = vmatprep.subr.bf16.mxu1 %v3852_v5  ;;  %v3682_v17 = vld [vmem:[%s4759_s4 + $0xc0] sm:$0xff]   ;;  %v3683_v18 = vld [vmem:[%s4759_s4 + $0x90] sm:$0xff]  }
  0x1d   : > { %p3797_p2 = por %p3796_p1, %p3795_p0 }
  0x1e   : > { %338 = vadd.xlane.f32.xlu0 %v3962_v1 }
  0x1f   : > { %3202 = vmatpush3.bf16.msra.mxu0 %v3640_v19  ;;  %3222 = vmatpush3.bf16.msra.mxu1 %v3641_v20  ;;  %v3686_v19 = vld [vmem:[%s4759_s4 + $0xd0] sm:$0xff]   ;;  %v3685_v20 = vld [vmem:[%s4759_s4 + $0x98] sm:$0xff]   ;;  %p3798_p3 = pnand %p3797_p2, %p3791_p13 }
  0x20   : > { %3203 = vmatprep.subr.bf16.mxu0 %v3852_v5  ;;  %3223 = vmatprep.subr.bf16.mxu1 %v3852_v5 }
  0x23   : > { %3204 = vmatpush3.bf16.msra.mxu0 %v3642_v21  ;;  %3224 = vmatpush3.bf16.msra.mxu1 %v3643_v22  ;;  %v3688_v21 = vld [vmem:[%s4759_s4 + $0xd8] sm:$0xff]   ;;  %v3687_v22 = vld [vmem:[%s4759_s4 + $0xa0] sm:$0xff]  }
  0x24   : > { %3205 = vmatprep.subr.bf16.mxu0 %v3852_v5  ;;  %3225 = vmatprep.subr.bf16.mxu1 %v3852_v5 }
  0x27   : > { %3206 = vmatpush3.bf16.msra.mxu0 %v3644_v23  ;;  %3226 = vmatpush3.bf16.msra.mxu1 %v3645_v24  ;;  %v3690_v23 = vld [vmem:[%s4759_s4 + $0xe0] sm:$0xff]   ;;  %v3689_v24 = vld [vmem:[%s4759_s4 + $0xa8] sm:$0xff]  }
  0x28   : > { %3207 = vmatprep.subr.bf16.mxu0 %v3852_v5  ;;  %3227 = vmatprep.subr.bf16.mxu1 %v3852_v5 }
  0x2b   : > { %3208 = vmatpush3.bf16.msra.mxu0 %v3646_v25  ;;  %3228 = vmatpush3.bf16.msra.mxu1 %v3647_v26  ;;  %v3692_v25 = vld [vmem:[%s4759_s4 + $0xe8] sm:$0xff]   ;;  %v3691_v26 = vld [vmem:[%s4759_s4 + $0xb0] sm:$0xff]  }
  0x2c   : > { %3233 = vmatprep.subr.bf16.mxu0 %v3852_v5  ;;  %3253 = vmatprep.subr.bf16.mxu1 %v3852_v5 }
  0xa7   : > { %v337_v7 = vpop.xlane.xlu0 %336 }
  0xa8   : > { %v341_v8 = vmul.f32 0.0078125, %v337_v7  ;;  %v3671_v7 = vld [vmem:[%s4759_s4 + $0x20] sm:$0xff]  }
  0xaa   : > { %v343_v9 = vsub.f32 %v3960_v0, %v341_v8  ;;  %v3674_v8 = vld [vmem:[%s4759_s4 + $0x60] sm:$0xff]   ;;  %v3681_v0 = vld [vmem:[%s4759_s4 + $0x88] sm:$0xff]  }
  0xab   : > { %v339_v10 = vpop.xlane.xlu0 %338 }
  0xac   : > { %v342_v11 = vmul.f32 0.0078125, %v339_v10  ;;  %v345_v12 = vmul.f32 %v343_v9, %v343_v9  ;;  %v3676_v10 = vld [vmem:[%s4759_s4 + $0x68] sm:$0xff]  }
  0xae   : > { %v344_v13 = vsub.f32 %v3962_v1, %v342_v11  ;;  %347 = vadd.xlane.f32.xlu1 %v345_v12  ;;  %v3675_v11 = vld [vmem:[%s4759_s4 + $0x30] sm:$0xff]   ;;  %v3684_v1 = vld [vmem:[%s4759_s4 + $0xc8] sm:$0xff]  }
  0xaf   : > { %v3678_v12 = vld [vmem:[%s4759_s4 + $0x70] sm:$0xff]  }
  0xb0   : > { %v346_v14 = vmul.f32 %v344_v13, %v344_v13 }
  0xb2   : > { %349 = vadd.xlane.f32.xlu1 %v346_v14  ;;  %v3680_v14 = vld [vmem:[%s4759_s4 + $0x78] sm:$0xff]  }
 0x13b   : > { %v348_v27 = vpop.xlane.xlu1 %347 }
 0x13c   : > { %v351_v28 = vmul.f32 0.0078125, %v348_v27  ;;  %v3694_v27 = vld [vmem:[%s4759_s4 + $0xf0] sm:$0xff]  }
 0x13e   : > { %v353_v29 = vadd.f32 1e-05, %v351_v28  ;;  %v3693_v28 = vld [vmem:[%s4759_s4 + $0xb8] sm:$0xff]  }
 0x13f   : > { %v350_v30 = vpop.xlane.xlu1 %349 }
 0x140   : > { %3736 = vrsqrt.f32 %v353_v29  ;;  %v352_v31 = vmul.f32 0.0078125, %v350_v30  ;;  %v3695_v29 = vld [vmem:[%s4759_s4 + $0xf8] sm:$0xff]   ;;  %v3696_v30 = vld [vmem:[%s4760_s5] sm:$0xff]  }
 0x142   : > { %v354_v32 = vadd.f32 1e-05, %v352_v31  ;;  %v3712_v31 = vld [vmem:[%s4760_s5 + $0x40] sm:$0xff]  }
 0x144   : > { %3738 = vrsqrt.f32 %v354_v32  ;;  %v3697_v32 = vld [vmem:[%s4760_s5 + $0x8] sm:$0xff]  }
 0x14a   : > { %v3737_v33 = vpop.eup %3736 }
 0x14b   : > { %v357_v34 = vmul.f32 %v3737_v33, %v343_v9  ;;  %v3673_v9 = vld [vmem:[%s4759_s4 + $0x28] sm:$0xff]  }
 0x14c   : > { %v3713_v33 = vld [vmem:[%s4760_s5 + $0x48] sm:$0xff]  }
 0x14d   : > { %v365_v38 = vmul.f32 %v2908_v35, %v357_v34  ;;  %v3698_v34 = vld [vmem:[%s4760_s5 + $0x10] sm:$0xff]  }
 0x14e   : > { %v3739_v36 = vpop.eup %3738 }
 0x14f   : > { %v358_v37 = vmul.f32 %v3739_v36, %v344_v13  ;;  %v373_v41 = vadd.f32 %v2909_v39, %v365_v38  ;;  %v3677_v13 = vld [vmem:[%s4759_s4 + $0x38] sm:$0xff]   ;;  %v3700_v38 = vld [vmem:[%s4760_s5 + $0x20] sm:$0xff]  }
 0x150   : > { %v3699_v36 = vld [vmem:[%s4760_s5 + $0x18] sm:$0xff]  }
 0x151   : > { %v366_v40 = vmul.f32 %v2908_v35, %v358_v37  ;;  %v3714_v35 = vld [vmem:[%s4760_s5 + $0x50] sm:$0xff]   ;;  %v3715_v37 = vld [vmem:[%s4760_s5 + $0x58] sm:$0xff]  }
 0x153   : > { %v374_v42 = vadd.f32 %v2909_v39, %v366_v40  ;;  %v3716_v39 = vld [vmem:[%s4760_s5 + $0x60] sm:$0xff]   ;;  %v3701_v40 = vld [vmem:[%s4760_s5 + $0x28] sm:$0xff]  }
 0x155   : > { %v375_v45 = vpack.c.bf16 %v374_v42, %v373_v41  ;;  %v3717_v41 = vld [vmem:[%s4760_s5 + $0x68] sm:$0xff]   ;;  %v3702_v42 = vld [vmem:[%s4760_s5 + $0x30] sm:$0xff]  }
 0x157   : > { %3210 = vmatmul.mubr.bf16.vlgmr.msra.gmra.mrb[0].mxu0 %v375_v45  ;;  %3230 = vmatmul.mubr.bf16.vlgmr.msra.gmra.mrb[0].mxu1 %v375_v45 }
 0x158   : > { %3234 = vmatpush3.bf16.msra.mxu0 %v3648_v43  ;;  %3254 = vmatpush3.bf16.msra.mxu1 %v3649_v44  ;;  %v3718_v43 = vld [vmem:[%s4760_s5 + $0x70] sm:$0xff]   ;;  %v3703_v44 = vld [vmem:[%s4760_s5 + $0x38] sm:$0xff]  }
 0x159   : > { %3235 = vmatprep.subr.bf16.mxu0 %v3852_v5  ;;  %3255 = vmatprep.subr.bf16.mxu1 %v3852_v5 }
 0x15a   : > { %3249 = vmatprep.mubr.msk.bf16.mxu0 %vm3853_vm0, %v3852_v5  ;;  %3269 = vmatprep.mubr.msk.bf16.mxu1 %vm3853_vm0, %v3852_v5 }
 0x15c   : > { %3236 = vmatpush3.bf16.msra.mxu0 %v3650_v46  ;;  %3256 = vmatpush3.bf16.msra.mxu1 %v3651_v47  ;;  %v3704_v46 = vld [vmem:[%s4760_s5 + $0x80] sm:$0xff]  }
 0x15d   : > { %3237 = vmatprep.subr.bf16.mxu0 %v3852_v5  ;;  %3257 = vmatprep.subr.bf16.mxu1 %v3852_v5  ;;  %v3720_v47 = vld [vmem:[%s4760_s5 + $0xc0] sm:$0xff]  }
 0x160   : > { %3238 = vmatpush3.bf16.msra.mxu0 %v3652_v48  ;;  %3258 = vmatpush3.bf16.msra.mxu1 %v3653_v49  ;;  %v3705_v48 = vld [vmem:[%s4760_s5 + $0x88] sm:$0xff]  }
 0x161   : > { %3239 = vmatprep.subr.bf16.mxu0 %v3852_v5  ;;  %3259 = vmatprep.subr.bf16.mxu1 %v3852_v5  ;;  %v3721_v49 = vld [vmem:[%s4760_s5 + $0xc8] sm:$0xff]  }
 0x164   : > { %3240 = vmatpush3.bf16.msra.mxu0 %v3654_v50  ;;  %3260 = vmatpush3.bf16.msra.mxu1 %v3655_v51  ;;  %v3706_v50 = vld [vmem:[%s4760_s5 + $0x90] sm:$0xff]  }
 0x165   : > { %3241 = vmatprep.subr.bf16.mxu0 %v3852_v5  ;;  %3261 = vmatprep.subr.bf16.mxu1 %v3852_v5  ;;  %v3722_v51 = vld [vmem:[%s4760_s5 + $0xd0] sm:$0xff]  }
 0x168   : > { %3242 = vmatpush3.bf16.msra.mxu0 %v3656_v52  ;;  %3262 = vmatpush3.bf16.msra.mxu1 %v3657_v53  ;;  %v3707_v52 = vld [vmem:[%s4760_s5 + $0x98] sm:$0xff]  }
 0x169   : > { %3243 = vmatprep.subr.bf16.mxu0 %v3852_v5  ;;  %3263 = vmatprep.subr.bf16.mxu1 %v3852_v5  ;;  %v3723_v53 = vld [vmem:[%s4760_s5 + $0xd8] sm:$0xff]  }
 0x16c   : > { %3244 = vmatpush3.bf16.msra.mxu0 %v3658_v54  ;;  %3264 = vmatpush3.bf16.msra.mxu1 %v3659_v55  ;;  %v3708_v54 = vld [vmem:[%s4760_s5 + $0xa0] sm:$0xff]  }
 0x16d   : > { %3245 = vmatprep.subr.bf16.mxu0 %v3852_v5  ;;  %3265 = vmatprep.subr.bf16.mxu1 %v3852_v5  ;;  %v3724_v55 = vld [vmem:[%s4760_s5 + $0xe0] sm:$0xff]  }
 0x170   : > { %3246 = vmatpush3.bf16.msra.mxu0 %v3660_v56  ;;  %3266 = vmatpush3.bf16.msra.mxu1 %v3661_v57  ;;  %v3709_v56 = vld [vmem:[%s4760_s5 + $0xa8] sm:$0xff]  }
 0x171   : > { %3247 = vmatprep.subr.bf16.mxu0 %v3852_v5  ;;  %3267 = vmatprep.subr.bf16.mxu1 %v3852_v5  ;;  %v3725_v57 = vld [vmem:[%s4760_s5 + $0xe8] sm:$0xff]  }
 0x174   : > { %3248 = vmatpush3.bf16.msra.mxu0 %v3662_v58  ;;  %3268 = vmatpush3.bf16.msra.mxu1 %v3663_v59  ;;  %v3710_v58 = vld [vmem:[%s4760_s5 + $0xb0] sm:$0xff]  }
 0x175   : > { %3273 = vmatprep.subr.bf16.mxu0 %v3852_v5  ;;  %3293 = vmatprep.subr.bf16.mxu1 %v3852_v5  ;;  %v3726_v59 = vld [vmem:[%s4760_s5 + $0xf0] sm:$0xff]  }
 0x177   : > { %3250 = vmatmul.mubr.bf16.vlgmr.msra.gmra.mrb[4].mxu0 %v375_v45  ;;  %3270 = vmatmul.mubr.bf16.vlgmr.msra.gmra.mrb[4].mxu1 %v375_v45  ;;  %v3719_v45 = vld [vmem:[%s4760_s5 + $0x78] sm:$0xff]  }
 0x178   : > { %3274 = vmatpush3.bf16.msra.mxu0 %v3664_v60  ;;  %3294 = vmatpush3.bf16.msra.mxu1 %v3666_v61  ;;  %v3711_v60 = vld [vmem:[%s4760_s5 + $0xb8] sm:$0xff]  }
 0x179   : > { %3275 = vmatprep.subr.bf16.mxu0 %v3852_v5  ;;  %3295 = vmatprep.subr.bf16.mxu1 %v3852_v5  ;;  %v3727_v61 = vld [vmem:[%s4760_s5 + $0xf8] sm:$0xff]  }
 0x17a   : > { %3289 = vmatprep.mubr.msk.bf16.mxu0 %vm3853_vm0, %v3852_v5  ;;  %3309 = vmatprep.mubr.msk.bf16.mxu1 %vm3853_vm0, %v3852_v5 }
 0x17c   : > { %3276 = vmatpush3.bf16.msra.mxu0 %v3665_v62  ;;  %3296 = vmatpush3.bf16.msra.mxu1 %v3668_v63  ;;  %v1834_v62 = vld [vmem:[%s4761_s6] sm:$0x1] }
 0x17d   : > { %3277 = vmatprep.subr.bf16.mxu0 %v3852_v5  ;;  %3297 = vmatprep.subr.bf16.mxu1 %v3852_v5  ;;  %v1839_v63 = vsel %vm1645_vm1, %v1834_v62, 0 }
 0x180   : > { %3278 = vmatpush3.bf16.msra.mxu0 %v3667_v2  ;;  %3298 = vmatpush3.bf16.msra.mxu1 %v3670_v3 }
 0x181   : > { %3279 = vmatprep.subr.bf16.mxu0 %v3852_v5  ;;  %3299 = vmatprep.subr.bf16.mxu1 %v3852_v5 }
 0x184   : > { %3280 = vmatpush3.bf16.msra.mxu0 %v3669_v4  ;;  %3300 = vmatpush3.bf16.msra.mxu1 %v3672_v6  ;;  %v1836_v4 = vld [vmem:[%s4761_s6 + $0x2] sm:$0x1] }
 0x185   : > { %3281 = vmatprep.subr.bf16.mxu0 %v3852_v5  ;;  %3301 = vmatprep.subr.bf16.mxu1 %v3852_v5 }
 0x188   : > { %3282 = vmatpush3.bf16.msra.mxu0 %v3671_v7  ;;  %3302 = vmatpush3.bf16.msra.mxu1 %v3674_v8 }
 0x189   : > { %3283 = vmatprep.subr.bf16.mxu0 %v3852_v5  ;;  %3303 = vmatprep.subr.bf16.mxu1 %v3852_v5 }
 0x18c   : > { %3284 = vmatpush3.bf16.msra.mxu0 %v3673_v9  ;;  %3304 = vmatpush3.bf16.msra.mxu1 %v3676_v10 }
 0x18d   : > { %3285 = vmatprep.subr.bf16.mxu0 %v3852_v5  ;;  %3305 = vmatprep.subr.bf16.mxu1 %v3852_v5 }
 0x190   : > { %3286 = vmatpush3.bf16.msra.mxu0 %v3675_v11  ;;  %3306 = vmatpush3.bf16.msra.mxu1 %v3678_v12 }
 0x191   : > { %3287 = vmatprep.subr.bf16.mxu0 %v3852_v5  ;;  %3307 = vmatprep.subr.bf16.mxu1 %v3852_v5 }
 0x194   : > { %3288 = vmatpush3.bf16.msra.mxu0 %v3677_v13  ;;  %3308 = vmatpush3.bf16.msra.mxu1 %v3680_v14  ;;  %v1927_v14 = vsel %vm1645_vm1, %v1836_v4, 0 }
 0x195   : > { %3313 = vmatprep.subr.bf16.mxu0 %v3852_v5  ;;  %3333 = vmatprep.subr.bf16.mxu1 %v3852_v5 }
 0x197   : > { %3290 = vmatmul.mubr.bf16.vlgmr.msra.gmra.mrb[8].mxu0 %v4180_v15  ;;  %3310 = vmatmul.mubr.bf16.vlgmr.msra.gmra.mrb[8].mxu1 %v4180_v15 }
 0x198   : > { %3314 = vmatpush3.bf16.msra.mxu0 %v3679_v16  ;;  %3334 = vmatpush3.bf16.msra.mxu1 %v3682_v17 }
 0x199   : > { %3315 = vmatprep.subr.bf16.mxu0 %v3852_v5  ;;  %3335 = vmatprep.subr.bf16.mxu1 %v3852_v5 }
 0x19a   : > { %3329 = vmatprep.mubr.msk.bf16.mxu0 %vm3853_vm0, %v3852_v5  ;;  %3349 = vmatprep.mubr.msk.bf16.mxu1 %vm3853_vm0, %v3852_v5 }
 0x19c   : > { %3316 = vmatpush3.bf16.msra.mxu0 %v3681_v0  ;;  %3336 = vmatpush3.bf16.msra.mxu1 %v3684_v1 }
 0x19d   : > { %3317 = vmatprep.subr.bf16.mxu0 %v3852_v5  ;;  %3337 = vmatprep.subr.bf16.mxu1 %v3852_v5 }
 0x1a0   : > { %3318 = vmatpush3.bf16.msra.mxu0 %v3683_v18  ;;  %3338 = vmatpush3.bf16.msra.mxu1 %v3686_v19 }
 0x1a1   : > { %3319 = vmatprep.subr.bf16.mxu0 %v3852_v5  ;;  %3339 = vmatprep.subr.bf16.mxu1 %v3852_v5 }
 0x1a4   : > { %3320 = vmatpush3.bf16.msra.mxu0 %v3685_v20  ;;  %3340 = vmatpush3.bf16.msra.mxu1 %v3688_v21 }
 0x1a5   : > { %3321 = vmatprep.subr.bf16.mxu0 %v3852_v5  ;;  %3341 = vmatprep.subr.bf16.mxu1 %v3852_v5 }
 0x1a8   : > { %3322 = vmatpush3.bf16.msra.mxu0 %v3687_v22  ;;  %3342 = vmatpush3.bf16.msra.mxu1 %v3690_v23 }
 0x1a9   : > { %3323 = vmatprep.subr.bf16.mxu0 %v3852_v5  ;;  %3343 = vmatprep.subr.bf16.mxu1 %v3852_v5 }
 0x1ac   : > { %3324 = vmatpush3.bf16.msra.mxu0 %v3689_v24  ;;  %3344 = vmatpush3.bf16.msra.mxu1 %v3692_v25 }
 0x1ad   : > { %3325 = vmatprep.subr.bf16.mxu0 %v3852_v5  ;;  %3345 = vmatprep.subr.bf16.mxu1 %v3852_v5 }
 0x1b0   : > { %3326 = vmatpush3.bf16.msra.mxu0 %v3691_v26  ;;  %3346 = vmatpush3.bf16.msra.mxu1 %v3694_v27 }
 0x1b1   : > { %3327 = vmatprep.subr.bf16.mxu0 %v3852_v5  ;;  %3347 = vmatprep.subr.bf16.mxu1 %v3852_v5 }
 0x1b4   : > { %3328 = vmatpush3.bf16.msra.mxu0 %v3693_v28  ;;  %3348 = vmatpush3.bf16.msra.mxu1 %v3695_v29 }
 0x1b5   : > { %3353 = vmatprep.subr.bf16.mxu0 %v3852_v5  ;;  %3373 = vmatprep.subr.bf16.mxu1 %v3852_v5 }
 0x1b7   : > { %3330 = vmatmul.mubr.bf16.vlgmr.msra.gmra.mrb[12].mxu0 %v4180_v15  ;;  %3350 = vmatmul.mubr.bf16.vlgmr.msra.gmra.mrb[12].mxu1 %v4180_v15 }
 0x1b8   : > { %3354 = vmatpush3.bf16.msra.mxu0 %v3696_v30  ;;  %3369 = vmatprep.mubr.msk.bf16.mxu0 %vm3853_vm0, %v3852_v5 }
 0x1b9   : > { %3355 = vmatprep.subr.bf16.mxu0 %v3852_v5  ;;  %3374 = vmatpush3.bf16.msra.mxu1 %v3712_v31 }
 0x1ba   : > { %3375 = vmatprep.subr.bf16.mxu1 %v3852_v5  ;;  %3389 = vmatprep.mubr.msk.bf16.mxu1 %vm3853_vm0, %v3852_v5 }
 0x1bc   : > { %3356 = vmatpush3.bf16.msra.mxu0 %v3697_v32 }
 0x1bd   : > { %3357 = vmatprep.subr.bf16.mxu0 %v3852_v5  ;;  %3376 = vmatpush3.bf16.msra.mxu1 %v3713_v33 }
 0x1be   : > { %3377 = vmatprep.subr.bf16.mxu1 %v3852_v5 }
 0x1c0   : > { %3358 = vmatpush3.bf16.msra.mxu0 %v3698_v34 }
 0x1c1   : > { %3359 = vmatprep.subr.bf16.mxu0 %v3852_v5  ;;  %3378 = vmatpush3.bf16.msra.mxu1 %v3714_v35 }
 0x1c2   : > { %3379 = vmatprep.subr.bf16.mxu1 %v3852_v5 }
 0x1c4   : > { %3360 = vmatpush3.bf16.msra.mxu0 %v3699_v36 }
 0x1c5   : > { %3361 = vmatprep.subr.bf16.mxu0 %v3852_v5  ;;  %3380 = vmatpush3.bf16.msra.mxu1 %v3715_v37 }
 0x1c6   : > { %3381 = vmatprep.subr.bf16.mxu1 %v3852_v5 }
 0x1c8   : > { %3362 = vmatpush3.bf16.msra.mxu0 %v3700_v38 }
 0x1c9   : > { %3363 = vmatprep.subr.bf16.mxu0 %v3852_v5  ;;  %3382 = vmatpush3.bf16.msra.mxu1 %v3716_v39 }
 0x1ca   : > { %3383 = vmatprep.subr.bf16.mxu1 %v3852_v5 }
 0x1cc   : > { %3364 = vmatpush3.bf16.msra.mxu0 %v3701_v40 }
 0x1cd   : > { %3365 = vmatprep.subr.bf16.mxu0 %v3852_v5  ;;  %3384 = vmatpush3.bf16.msra.mxu1 %v3717_v41 }
 0x1ce   : > { %3385 = vmatprep.subr.bf16.mxu1 %v3852_v5 }
 0x1d0   : > { %3366 = vmatpush3.bf16.msra.mxu0 %v3702_v42 }
 0x1d1   : > { %3367 = vmatprep.subr.bf16.mxu0 %v3852_v5  ;;  %3386 = vmatpush3.bf16.msra.mxu1 %v3718_v43 }
 0x1d2   : > { %3387 = vmatprep.subr.bf16.mxu1 %v3852_v5 }
 0x1d4   : > { %3368 = vmatpush3.bf16.msra.mxu0 %v3703_v44 }
 0x1d5   : > { %3393 = vmatprep.subr.bf16.mxu0 %v3852_v5  ;;  %3388 = vmatpush3.bf16.msra.mxu1 %v3719_v45 }
 0x1d6   : > { %3413 = vmatprep.subr.bf16.mxu1 %v3852_v5 }
 0x1d7   : > { %3370 = vmatmul.mubr.bf16.vlgmr.msra.gmra.mrb[16].mxu0 %v4180_v15 }
 0x1d8   : > { %3394 = vmatpush3.bf16.msra.mxu0 %v3704_v46  ;;  %3409 = vmatprep.mubr.msk.bf16.mxu0 %vm3853_vm0, %v3852_v5 }
 0x1d9   : > { %3395 = vmatprep.subr.bf16.mxu0 %v3852_v5  ;;  %3390 = vmatmul.mubr.bf16.vlgmr.msra.gmra.mrb[16].mxu1 %v4180_v15 }
 0x1da   : > { %3414 = vmatpush3.bf16.msra.mxu1 %v3720_v47  ;;  %3429 = vmatprep.mubr.msk.bf16.mxu1 %vm3853_vm0, %v3852_v5  ;;  %v1835_v47 = vld [vmem:[%s4761_s6 + $0x1] sm:$0x1] }
 0x1db   : > { %3415 = vmatprep.subr.bf16.mxu1 %v3852_v5 }
 0x1dc   : > { %3396 = vmatpush3.bf16.msra.mxu0 %v3705_v48  ;;  %v1883_v48 = vsel %vm1645_vm1, %v1835_v47, 0 }
 0x1dd   : > { %3397 = vmatprep.subr.bf16.mxu0 %v3852_v5 }
 0x1de   : > { %3416 = vmatpush3.bf16.msra.mxu1 %v3721_v49  ;;  %v1837_v49 = vld [vmem:[%s4761_s6 + $0x3] sm:$0x1] }
 0x1df   : > { %3417 = vmatprep.subr.bf16.mxu1 %v3852_v5 }
 0x1e0   : > { %3398 = vmatpush3.bf16.msra.mxu0 %v3706_v50  ;;  %v1971_v50 = vsel %vm1645_vm1, %v1837_v49, 0 }
 0x1e1   : > { %3399 = vmatprep.subr.bf16.mxu0 %v3852_v5 }
 0x1e2   : > { %3418 = vmatpush3.bf16.msra.mxu1 %v3722_v51 }
 0x1e3   : > { %3419 = vmatprep.subr.bf16.mxu1 %v3852_v5 }
 0x1e4   : > { %3400 = vmatpush3.bf16.msra.mxu0 %v3707_v52 }
 0x1e5   : > { %3401 = vmatprep.subr.bf16.mxu0 %v3852_v5 }
 0x1e6   : > { %3420 = vmatpush3.bf16.msra.mxu1 %v3723_v53 }
 0x1e7   : > { %3421 = vmatprep.subr.bf16.mxu1 %v3852_v5 }
 0x1e8   : > { %3402 = vmatpush3.bf16.msra.mxu0 %v3708_v54 }
 0x1e9   : > { %3403 = vmatprep.subr.bf16.mxu0 %v3852_v5 }
 0x1ea   : > { %3422 = vmatpush3.bf16.msra.mxu1 %v3724_v55 }
 0x1eb   : > { %3423 = vmatprep.subr.bf16.mxu1 %v3852_v5 }
 0x1ec   : > { %3404 = vmatpush3.bf16.msra.mxu0 %v3709_v56 }
 0x1ed   : > { %3405 = vmatprep.subr.bf16.mxu0 %v3852_v5 }
 0x1ee   : > { %3424 = vmatpush3.bf16.msra.mxu1 %v3725_v57 }
 0x1ef   : > { %3425 = vmatprep.subr.bf16.mxu1 %v3852_v5 }
 0x1f0   : > { %3406 = vmatpush3.bf16.msra.mxu0 %v3710_v58 }
 0x1f1   : > { %3407 = vmatprep.subr.bf16.mxu0 %v3852_v5 }
 0x1f2   : > { %3426 = vmatpush3.bf16.msra.mxu1 %v3726_v59 }
 0x1f3   : > { %3427 = vmatprep.subr.bf16.mxu1 %v3852_v5 }
 0x1f4   : > { %3408 = vmatpush3.bf16.msra.mxu0 %v3711_v60 }
 0x1f5   : > { %3457 = vmatprep.subr.bf16.mxu0 %v3852_v5 }
 0x1f6   : > { %3428 = vmatpush3.bf16.msra.mxu1 %v3727_v61 }
 0x1f7   : > { %3410 = vmatmul.mubr.bf16.vlgmr.msra.gmra.mrb[20].mxu0 %v4180_v15  ;;  %3433 = vmatprep.subr.bf16.mxu1 %v3852_v5 }
 0x1f8   : > { %3459 = vmatprep.mubr.msk.bf16.mxu0 %vm3853_vm0, %v3852_v5 }
 0x1f9   : > { %3430 = vmatmul.mubr.bf16.vlgmr.msra.gmra.mrb[20].mxu1 %v4180_v15 }
 0x1fa   : > { %3435 = vmatprep.mubr.msk.bf16.mxu1 %vm3853_vm0, %v3852_v5 }
 0x1fd   : > { %3458 = vmatpush3.bf16.xpose.msra.mxu0 %v1839_v63 }
 0x1fe   : > { %3469 = vmatprep.subr.bf16.mxu0 %v3852_v5 }
 0x22a   : > { %v523_v2 = vpop.f32.mrb[0].mxu0  ;;  %v612_v3 = vpop.f32.mrb[0].mxu1 }
 0x22b   : > { %v3211_v6 = vpop.f32.mrb[1].mxu0  ;;  %v3231_v7 = vpop.f32.mrb[1].mxu1 }
 0x22c   : > { %v526_v8 = vpop.f32.mrb[2].mxu0  ;;  %v615_v9 = vpop.f32.mrb[2].mxu1 }
 0x22d   : > { %v1637_v10 = vpack.c.bf16 %v526_v8, %v523_v2  ;;  %v4408_v11 = vpack.c.bf16 %v615_v9, %v612_v3  ;;  %v3212_v12 = vpop.f32.mrb[3].mxu0  ;;  %v3232_v13 = vpop.f32.mrb[3].mxu1 }
 0x22f   : > { %3460 = vmatmul.mubr.msk.bf16.vlgmr.msra.gmra.mrb[24].mxu0 %vm1645_vm1, %v1637_v10 }
 0x230   : > { %3470 = vmatpush3.bf16.xpose.msra.mxu0 %v1927_v14  ;;  %3471 = vmatprep.mubr.msk.bf16.mxu0 %vm3853_vm0, %v3852_v5 }
 0x231   : > { %3481 = vmatprep.subr.bf16.mxu0 %v3852_v5 }
 0x24a   : > { %v701_v15 = vpop.f32.mrb[4].mxu0  ;;  %v790_v16 = vpop.f32.mrb[4].mxu1 }
 0x24b   : > { %v3251_v17 = vpop.f32.mrb[5].mxu0  ;;  %v3271_v0 = vpop.f32.mrb[5].mxu1 }
 0x24c   : > { %v704_v1 = vpop.f32.mrb[6].mxu0  ;;  %v793_v18 = vpop.f32.mrb[6].mxu1 }
 0x24d   : > { %v1639_v19 = vpack.c.bf16 %v704_v1, %v701_v15  ;;  %v4415_v20 = vpack.c.bf16 %v793_v18, %v790_v16  ;;  %v3252_v21 = vpop.f32.mrb[7].mxu0  ;;  %v3272_v22 = vpop.f32.mrb[7].mxu1 }
 0x24f   : > { %3472 = vmatmul.mubr.msk.bf16.vlgmr.msra.gmra.mrb[28].mxu0 %vm1645_vm1, %v1639_v19 }
 0x250   : > { %3483 = vmatprep.mubr.msk.bf16.mxu0 %vm3853_vm0, %v3852_v5 }
 0x26a   : > { %v943_v23 = vpop.f32.mrb[8].mxu0  ;;  %v1032_v24 = vpop.f32.mrb[8].mxu1 }
 0x26b   : > { %v3291_v25 = vpop.f32.mrb[9].mxu0  ;;  %v3311_v26 = vpop.f32.mrb[9].mxu1 }
 0x26c   : > { %v946_v27 = vpop.f32.mrb[10].mxu0  ;;  %v1035_v28 = vpop.f32.mrb[10].mxu1 }
 0x26d   : > { %v1641_v29 = vpack.c.bf16 %v946_v27, %v943_v23  ;;  %v3292_v30 = vpop.f32.mrb[11].mxu0  ;;  %v1642_v31 = vpack.c.bf16 %v1035_v28, %v1032_v24  ;;  %v3312_v32 = vpop.f32.mrb[11].mxu1 }
 0x26e   : > { %v2196_v32 = vld [vmem:[%s4762_s7] sm:$0x1] }
 0x26f   : > { %v1650_v33 = vsel %vm1645_vm1, %v1641_v29, 0  ;;  %v1697_v34 = vsel %vm1645_vm1, %v1642_v31, 0 }
 0x270   : > { %3434 = vmatpush3.bf16.xpose.msra.mxu1 %v1650_v33  ;;  %v2205_v33 = vsel %vm2203_vm4, %v2196_v32, 0 }
 0x271   : > { %3439 = vmatprep.subr.bf16.mxu1 %v3852_v5  ;;  %3482 = vmatpush3.bf16.msra.mxu0 %v2205_v33 }
 0x272   : > { %3493 = vmatprep.subr.bf16.mxu0 %v3852_v5 }
 0x277   : > { %3436 = vmatmul.mubr.msk.bf16.vlgmr.msra.gmra.mrb[24].mxu1 %vm1645_vm1, %v1637_v10 }
 0x278   : > { %3440 = vmatpush3.bf16.xpose.msra.mxu1 %v1697_v34  ;;  %3441 = vmatprep.mubr.msk.bf16.mxu1 %vm3853_vm0, %v3852_v5 }
 0x279   : > { %3445 = vmatprep.subr.bf16.mxu1 %v3852_v5 }
 0x27f   : > { %3442 = vmatmul.mubr.msk.bf16.vlgmr.msra.gmra.mrb[28].mxu1 %vm1645_vm1, %v4408_v11 }
 0x280   : > { %3447 = vmatprep.mubr.msk.bf16.mxu1 %vm3853_vm0, %v3852_v5 }
 0x28a   : > { %v1121_v35 = vpop.f32.mrb[12].mxu0  ;;  %v1210_v36 = vpop.f32.mrb[12].mxu1 }
 0x28b   : > { %v3331_v37 = vpop.f32.mrb[13].mxu0  ;;  %v3351_v38 = vpop.f32.mrb[13].mxu1 }
 0x28c   : > { %v1124_v39 = vpop.f32.mrb[14].mxu0  ;;  %v1213_v40 = vpop.f32.mrb[14].mxu1 }
 0x28d   : > { %v1643_v41 = vpack.c.bf16 %v1124_v39, %v1121_v35  ;;  %v3332_v42 = vpop.f32.mrb[15].mxu0  ;;  %v1644_v43 = vpack.c.bf16 %v1213_v40, %v1210_v36  ;;  %v3352_v44 = vpop.f32.mrb[15].mxu1 }
 0x28f   : > { %v1744_v45 = vsel %vm1645_vm1, %v1643_v41, 0  ;;  %v1791_v46 = vsel %vm1645_vm1, %v1644_v43, 0 }
 0x290   : > { %3446 = vmatpush3.bf16.xpose.msra.mxu1 %v1744_v45 }
 0x291   : > { %3451 = vmatprep.subr.bf16.mxu1 %v3852_v5 }
 0x297   : > { %3448 = vmatmul.mubr.msk.bf16.vlgmr.msra.gmra.mrb[32].mxu1 %vm1645_vm1, %v1639_v19 }
 0x298   : > { %3452 = vmatpush3.bf16.xpose.msra.mxu1 %v1791_v46  ;;  %3453 = vmatprep.mubr.msk.bf16.mxu1 %vm3853_vm0, %v3852_v5 }
 0x299   : > { %3463 = vmatprep.subr.bf16.mxu1 %v3852_v5 }
 0x29f   : > { %3454 = vmatmul.mubr.msk.bf16.vlgmr.msra.gmra.mrb[36].mxu1 %vm1645_vm1, %v4415_v20 }
 0x2a0   : > { %3464 = vmatpush3.bf16.xpose.msra.mxu1 %v1883_v48  ;;  %3465 = vmatprep.mubr.msk.bf16.mxu1 %vm3853_vm0, %v3852_v5 }
 0x2a1   : > { %3475 = vmatprep.subr.bf16.mxu1 %v3852_v5 }
 0x2a7   : > { %3466 = vmatmul.mubr.msk.bf16.vlgmr.msra.gmra.mrb[40].mxu1 %vm1645_vm1, %v4408_v11 }
 0x2a8   : > { %3476 = vmatpush3.bf16.xpose.msra.mxu1 %v1971_v50  ;;  %3477 = vmatprep.mubr.msk.bf16.mxu1 %vm3853_vm0, %v3852_v5 }
 0x2a9   : > { %3487 = vmatprep.subr.bf16.mxu1 %v3852_v5 }
 0x2aa   : > { %v4456_v51 = vpop.f32.mrb[16].mxu0 }
 0x2ab   : > { %v3371_v52 = vpop.f32.mrb[17].mxu0 }
 0x2ac   : > { %v4458_v53 = vpop.f32.mrb[18].mxu0  ;;  %v4460_v54 = vpop.f32.mrb[16].mxu1 }
 0x2ad   : > { %v2188_v55 = vpack.c.bf16 %v4458_v53, %v4456_v51  ;;  %v3372_v56 = vpop.f32.mrb[19].mxu0  ;;  %v3391_v57 = vpop.f32.mrb[17].mxu1 }
 0x2ae   : > { %v4464_v58 = vpop.f32.mrb[18].mxu1 }
 0x2af   : > { %3478 = vmatmul.mubr.msk.bf16.vlgmr.msra.gmra.mrb[44].mxu1 %vm1645_vm1, %v4415_v20  ;;  %v2189_v59 = vpack.c.bf16 %v4464_v58, %v4460_v54  ;;  %v3392_v60 = vpop.f32.mrb[19].mxu1  ;;  %v3728_v58 = vld [vmem:[%s4763_s8] sm:$0xff]  }
 0x2b0   : > { %3489 = vmatprep.mubr.msk.bf16.mxu1 %vm3853_vm0, %v3852_v5 }
 0x2ca   : > { %v4472_v61 = vpop.f32.mrb[20].mxu0 }
 0x2cb   : > { %v3411_v62 = vpop.f32.mrb[21].mxu0 }
 0x2cc   : > { %v4474_v63 = vpop.f32.mrb[22].mxu0  ;;  %v4476_v2 = vpop.f32.mrb[20].mxu1 }
 0x2cd   : > { %v2190_v3 = vpack.c.bf16 %v4474_v63, %v4472_v61  ;;  %v3412_v4 = vpop.f32.mrb[23].mxu0  ;;  %v3431_v6 = vpop.f32.mrb[21].mxu1 }
 0x2ce   : > { %v4480_v7 = vpop.f32.mrb[22].mxu1 }
 0x2cf   : > { %v2191_v8 = vpack.c.bf16 %v4480_v7, %v4476_v2  ;;  %v3432_v9 = vpop.f32.mrb[23].mxu1 }
 0x2d0   : > { %v2197_v9 = vld [vmem:[%s4762_s7 + $0x1] sm:$0x1] }
 0x302   : > { %v4484_v10 = vpop.f32.mrb[24].mxu0 }
 0x303   : > { %v3461_v11 = vpop.f32.mrb[25].mxu0  ;;  %v2040_v12 = vsel %vm2039_vm2, %v4484_v10, -inf }
 0x304   : > { %2041 = vmax.xlane.f32.xlu0 %v2040_v12  ;;  %v4488_v13 = vpop.f32.mrb[26].mxu0  ;;  %v2252_v11 = vsel %vm2203_vm4, %v2197_v9, 0 }
 0x305   : > { %v3462_v14 = vpop.f32.mrb[27].mxu0  ;;  %v2043_v15 = vsel %vm2039_vm2, %v4488_v13, -inf  ;;  %3488 = vmatpush3.bf16.msra.mxu1 %v2252_v11 }
 0x306   : > { %2044 = vmax.xlane.f32.xlu1 %v2043_v15  ;;  %3499 = vmatprep.subr.bf16.mxu1 %v3852_v5 }
 0x322   : > { %v4492_v16 = vpop.f32.mrb[28].mxu0 }
 0x323   : > { %v3473_v17 = vpop.f32.mrb[29].mxu0  ;;  %v2052_v0 = vsel %vm2039_vm2, %v4492_v16, -inf }
 0x324   : > { %2053 = vmax.xlane.f32.xlu0 %v2052_v0  ;;  %v4496_v1 = vpop.f32.mrb[30].mxu0 }
 0x325   : > { %v3474_v18 = vpop.f32.mrb[31].mxu0  ;;  %v2055_v19 = vsel %vm2039_vm2, %v4496_v1, -inf }
 0x326   : > { %2056 = vmax.xlane.f32.xlu1 %v2055_v19 }
 0x34a   : > { %v4500_v20 = vpop.f32.mrb[24].mxu1 }
 0x34b   : > { %v3437_v21 = vpop.f32.mrb[25].mxu1  ;;  %v2015_v22 = vsel %vm2014_vm3, %v4500_v20, -inf }
 0x34c   : > { %v4504_v23 = vpop.f32.mrb[26].mxu1  ;;  %2016 = vmax.xlane.f32.xlu0 %v2015_v22 }
 0x34d   : > { %v3438_v24 = vpop.f32.mrb[27].mxu1  ;;  %v2018_v25 = vsel %vm2014_vm3, %v4504_v23, -inf }
 0x34e   : > { %2019 = vmax.xlane.f32.xlu1 %v2018_v25 }
 0x352   : > { %v4508_v26 = vpop.f32.mrb[28].mxu1 }
 0x353   : > { %v3443_v27 = vpop.f32.mrb[29].mxu1  ;;  %v2021_v28 = vsel %vm2014_vm3, %v4508_v26, -inf }
 0x354   : > { %v4512_v29 = vpop.f32.mrb[30].mxu1  ;;  %2022 = vmax.xlane.f32.xlu0 %v2021_v28 }
 0x355   : > { %v3444_v30 = vpop.f32.mrb[31].mxu1  ;;  %v2024_v31 = vsel %vm2014_vm3, %v4512_v29, -inf }
 0x356   : > { %2025 = vmax.xlane.f32.xlu1 %v2024_v31 }
 0x36a   : > { %v4521_v34 = vpop.f32.mrb[32].mxu1 }
 0x36b   : > { %v3449_v35 = vpop.f32.mrb[33].mxu1  ;;  %v2027_v36 = vsel %vm2014_vm3, %v4521_v34, -inf }
 0x36c   : > { %v4525_v37 = vpop.f32.mrb[34].mxu1  ;;  %2028 = vmax.xlane.f32.xlu0 %v2027_v36 }
 0x36d   : > { %v3450_v38 = vpop.f32.mrb[35].mxu1  ;;  %v2030_v39 = vsel %vm2014_vm3, %v4525_v37, -inf }
 0x36e   : > { %2031 = vmax.xlane.f32.xlu1 %v2030_v39 }
 0x372   : > { %v4529_v40 = vpop.f32.mrb[36].mxu1 }
 0x373   : > { %v3455_v41 = vpop.f32.mrb[37].mxu1  ;;  %v2033_v50 = vsel %vm2014_vm3, %v4529_v40, -inf }
 0x374   : > { %v4531_v42 = vpop.f32.mrb[38].mxu1 }
 0x375   : > { %v3456_v43 = vpop.f32.mrb[39].mxu1  ;;  %v2036_v52 = vsel %vm2014_vm3, %v4531_v42, -inf }
 0x37a   : > { %v4533_v44 = vpop.f32.mrb[40].mxu1 }
 0x37b   : > { %v3467_v45 = vpop.f32.mrb[41].mxu1  ;;  %v2046_v46 = vsel %vm2039_vm2, %v4533_v44, -inf }
 0x37c   : > { %v4537_v47 = vpop.f32.mrb[42].mxu1  ;;  %2047 = vmax.xlane.f32.xlu0 %v2046_v46 }
 0x37d   : > { %v3468_v48 = vpop.f32.mrb[43].mxu1  ;;  %v2049_v49 = vsel %vm2039_vm2, %v4537_v47, -inf }
 0x37e   : > { %2050 = vmax.xlane.f32.xlu1 %v2049_v49 }
 0x380   : > { %2034 = vmax.xlane.f32.xlu0 %v2033_v50 }
 0x382   : > { %v4545_v56 = vpop.f32.mrb[44].mxu1  ;;  %2037 = vmax.xlane.f32.xlu1 %v2036_v52 }
 0x383   : > { %v3479_v57 = vpop.f32.mrb[45].mxu1  ;;  %v2058_v60 = vsel %vm2039_vm2, %v4545_v56, -inf }
 0x384   : > { %v4549_v62 = vpop.f32.mrb[46].mxu1  ;;  %2059 = vmax.xlane.f32.xlu0 %v2058_v60 }
 0x385   : > { %v3480_v4 = vpop.f32.mrb[47].mxu1  ;;  %v2061_v6 = vsel %vm2039_vm2, %v4549_v62, -inf }
 0x386   : > { %2062 = vmax.xlane.f32.xlu1 %v2061_v6 }
 0x391   : > { %v2042_v12 = vpop.xlane.xlu0 %2041 }
 0x393   : > { %v2045_v14 = vpop.xlane.xlu1 %2044 }
 0x3b1   : > { %v2054_v15 = vpop.xlane.xlu0 %2053 }
 0x3b3   : > { %v2057_v17 = vpop.xlane.xlu1 %2056 }
 0x3d9   : > { %v2017_v0 = vpop.xlane.xlu0 %2016 }
 0x3da   : > { %v2064_v18 = vmax.f32 %v2017_v0, %v2042_v12 }
 0x3db   : > { %v2020_v19 = vpop.xlane.xlu1 %2019 }
 0x3dc   : > { %v2072_v21 = vsub.f32 %v4500_v20, %v2064_v18  ;;  %v2096_v22 = vsub.f32 %v4484_v10, %v2064_v18  ;;  %v2065_v24 = vmax.f32 %v2020_v19, %v2045_v14  ;;  %v2198_v10 = vld [vmem:[%s4762_s7 + $0x2] sm:$0x1] }
 0x3dd   : > { %v2299_v41 = vsel %vm2203_vm4, %v2198_v10, 0 }
 0x3de   : > { %v2080_v25 = vmul.f32 1.442695, %v2072_v21  ;;  %v2104_v27 = vmul.f32 1.442695, %v2096_v22  ;;  %v2073_v28 = vsub.f32 %v4504_v23, %v2065_v24  ;;  %v2097_v30 = vsub.f32 %v4488_v13, %v2065_v24 }
 0x3e0   : > { %3740 = vpow2.f32 %v2080_v25  ;;  %v2082_v31 = vmul.f32 1.442695, %v2073_v28  ;;  %v2106_v32 = vmul.f32 1.442695, %v2097_v30 }
 0x3e1   : > { %3742 = vpow2.f32 %v2104_v27  ;;  %v2023_v46 = vpop.xlane.xlu0 %2022 }
 0x3e2   : > { %3744 = vpow2.f32 %v2082_v31 }
 0x3e3   : > { %3746 = vpow2.f32 %v2106_v32  ;;  %v2026_v48 = vpop.xlane.xlu1 %2025 }
 0x3ea   : > { %v4562_v33 = vpop.eup %3740 }
 0x3eb   : > { %v3743_v35 = vpop.eup %3742  ;;  %v2120_v20 = vsel %vm2014_vm3, %v4562_v33, 0.0 }
 0x3ec   : > { %v4569_v36 = vpop.eup %3744  ;;  %2121 = vadd.xlane.f32.xlu0 %v2120_v20  ;;  %v2144_v43 = vsel %vm2039_vm2, %v3743_v35, 0.0 }
 0x3ed   : > { %v3747_v13 = vpop.eup %3746  ;;  %v2123_v23 = vsel %vm2014_vm3, %v4569_v36, 0.0  ;;  %v2184_v38 = vpack.c.bf16 %v4569_v36, %v4562_v33 }
 0x3ee   : > { %2124 = vadd.xlane.f32.xlu1 %v2123_v23  ;;  %v2192_v39 = vpack.c.bf16 %v3747_v13, %v3743_v35  ;;  %v2147_v45 = vsel %vm2039_vm2, %v3747_v13, 0.0 }
 0x3f0   : > { %3484 = vmatmul.mubr.msk.bf16.vlgmr.msra.gmra.mrb[32].mxu0 %vm2039_vm2, %v2192_v39  ;;  %2145 = vadd.xlane.f32.xlu0 %v2144_v43 }
 0x3f1   : > { %3494 = vmatpush3.bf16.msra.mxu0 %v2299_v41  ;;  %3495 = vmatprep.mubr.msk.bf16.mxu0 %vm3853_vm0, %v3852_v5 }
 0x3f2   : > { %2148 = vadd.xlane.f32.xlu1 %v2147_v45  ;;  %3505 = vmatprep.subr.bf16.mxu0 %v3852_v5 }
 0x3f9   : > { %v2029_v49 = vpop.xlane.xlu0 %2028 }
 0x3fa   : > { %v2068_v50 = vmax.f32 %v2029_v49, %v2054_v15 }
 0x3fb   : > { %v2032_v52 = vpop.xlane.xlu1 %2031 }
 0x3fc   : > { %v2076_v57 = vsub.f32 %v4521_v34, %v2068_v50  ;;  %v2100_v60 = vsub.f32 %v4492_v16, %v2068_v50  ;;  %v2069_v4 = vmax.f32 %v2032_v52, %v2057_v17 }
 0x3fe   : > { %v2088_v6 = vmul.f32 1.442695, %v2076_v57  ;;  %v2077_v9 = vsub.f32 %v4525_v37, %v2069_v4  ;;  %v2101_v11 = vsub.f32 %v4496_v1, %v2069_v4  ;;  %v2112_v12 = vmul.f32 1.442695, %v2100_v60 }
 0x400   : > { %v2090_v14 = vmul.f32 1.442695, %v2077_v9  ;;  %v2114_v0 = vmul.f32 1.442695, %v2101_v11  ;;  %3748 = vpow2.f32 %v2088_v6 }
 0x402   : > { %3750 = vpow2.f32 %v2090_v14 }
 0x403   : > { %3752 = vpow2.f32 %v2114_v0 }
 0x404   : > { %3754 = vpow2.f32 %v2112_v12 }
 0x409   : > { %v2048_v18 = vpop.xlane.xlu0 %2047 }
 0x40a   : > { %v2066_v15 = vmax.f32 %v2023_v46, %v2048_v18  ;;  %v4586_v19 = vpop.eup %3748 }
 0x40b   : > { %v2051_v34 = vpop.xlane.xlu1 %2050  ;;  %v2132_v50 = vsel %vm2014_vm3, %v4586_v19, 0.0 }
 0x40c   : > { %v4588_v21 = vpop.eup %3750  ;;  %v2074_v16 = vsub.f32 %v4508_v26, %v2066_v15  ;;  %v2098_v37 = vsub.f32 %v4533_v44, %v2066_v15  ;;  %v2067_v17 = vmax.f32 %v2026_v48, %v2051_v34 }
 0x40d   : > { %v4592_v1 = vpop.eup %3752  ;;  %v2035_v22 = vpop.xlane.xlu0 %2034  ;;  %v2186_v24 = vpack.c.bf16 %v4588_v21, %v4586_v19  ;;  %v2135_v60 = vsel %vm2014_vm3, %v4588_v21, 0.0 }
 0x40e   : > { %v4596_v25 = vpop.eup %3754  ;;  %v2084_v27 = vmul.f32 1.442695, %v2074_v16  ;;  %v2108_v28 = vmul.f32 1.442695, %v2098_v37  ;;  %v2075_v30 = vsub.f32 %v4512_v29, %v2067_v17  ;;  %v2099_v31 = vsub.f32 %v4537_v47, %v2067_v17 }
 0x40f   : > { %v2194_v26 = vpack.c.bf16 %v4592_v1, %v4596_v25  ;;  %v2038_v32 = vpop.xlane.xlu1 %2037  ;;  %v2156_v9 = vsel %vm2039_vm2, %v4596_v25, 0.0  ;;  %v2159_v11 = vsel %vm2039_vm2, %v4592_v1, 0.0 }
 0x410   : > { %3756 = vpow2.f32 %v2084_v27  ;;  %v2086_v44 = vmul.f32 1.442695, %v2075_v30  ;;  %v2110_v35 = vmul.f32 1.442695, %v2099_v31 }
 0x411   : > { %3758 = vpow2.f32 %v2108_v28  ;;  %3496 = vmatmul.mubr.msk.bf16.vlgmr.msra.gmra.mrb[36].mxu0 %vm2039_vm2, %v2194_v26  ;;  %v2060_v20 = vpop.xlane.xlu0 %2059 }
 0x412   : > { %3760 = vpow2.f32 %v2086_v44  ;;  %3506 = vmatpush3.bf16.msra.mxu0 %v2188_v55  ;;  %v2070_v10 = vmax.f32 %v2035_v22, %v2060_v20  ;;  %3507 = vmatprep.mubr.msk.bf16.mxu0 %vm3853_vm0, %v3852_v5 }
 0x413   : > { %3762 = vpow2.f32 %v2110_v35  ;;  %v2063_v29 = vpop.xlane.xlu1 %2062  ;;  %3517 = vmatprep.subr.bf16.mxu0 %v3852_v5 }
 0x414   : > { %v2078_v47 = vsub.f32 %v4529_v40, %v2070_v10  ;;  %v2102_v13 = vsub.f32 %v4545_v56, %v2070_v10  ;;  %v2071_v23 = vmax.f32 %v2038_v32, %v2063_v29  ;;  %v2199_v56 = vld [vmem:[%s4762_s7 + $0x3] sm:$0x1]  ;;  %v3730_v10 = vld [vmem:[%s4763_s8 + $0x10] sm:$0xff]  }
 0x416   : > { %v2092_v39 = vmul.f32 1.442695, %v2078_v47  ;;  %v2116_v41 = vmul.f32 1.442695, %v2102_v13  ;;  %v2079_v43 = vsub.f32 %v4531_v42, %v2071_v23  ;;  %v2103_v51 = vsub.f32 %v4549_v62, %v2071_v23  ;;  %v3731_v13 = vld [vmem:[%s4763_s8 + $0x18] sm:$0xff]  }
 0x418   : > { %3764 = vpow2.f32 %v2092_v39  ;;  %v2094_v53 = vmul.f32 1.442695, %v2079_v43  ;;  %v2118_v55 = vmul.f32 1.442695, %v2103_v51 }
 0x419   : > { %3766 = vpow2.f32 %v2116_v41  ;;  %3508 = vmatmul.mubr.msk.bf16.vlgmr.msra.gmra.mrb[32].mxu0 %vm2014_vm3, %v2184_v38 }
 0x41a   : > { %v3757_v45 = vpop.eup %3756  ;;  %3768 = vpow2.f32 %v2094_v53  ;;  %3518 = vmatpush3.bf16.msra.mxu0 %v2190_v3  ;;  %3519 = vmatprep.mubr.msk.bf16.mxu0 %vm3853_vm0, %v3852_v5  ;;  %v2346_v3 = vsel %vm2203_vm4, %v2199_v56, 0 }
 0x41b   : > { %v3759_v40 = vpop.eup %3758  ;;  %3770 = vpow2.f32 %v2118_v55  ;;  %v2126_v42 = vsel %vm2014_vm3, %v3757_v45, 0.0  ;;  %3529 = vmatprep.subr.bf16.mxu0 %v3852_v5 }
 0x41c   : > { %v3761_v62 = vpop.eup %3760  ;;  %2127 = vadd.xlane.f32.xlu0 %v2126_v42  ;;  %v2150_v38 = vsel %vm2039_vm2, %v3759_v40, 0.0 }
 0x41d   : > { %v3763_v33 = vpop.eup %3762  ;;  %v2129_v36 = vsel %vm2014_vm3, %v3761_v62, 0.0  ;;  %v2185_v61 = vpack.c.bf16 %v3761_v62, %v3757_v45 }
 0x41e   : > { %2130 = vadd.xlane.f32.xlu1 %v2129_v36  ;;  %v2193_v63 = vpack.c.bf16 %v3763_v33, %v3759_v40  ;;  %v2153_v46 = vsel %vm2039_vm2, %v3763_v33, 0.0 }
 0x420   : > { %3490 = vmatmul.mubr.msk.bf16.vlgmr.msra.gmra.mrb[48].mxu1 %vm2039_vm2, %v2193_v63  ;;  %2151 = vadd.xlane.f32.xlu0 %v2150_v38 }
 0x421   : > { %3520 = vmatmul.mubr.msk.bf16.vlgmr.msra.gmra.mrb[36].mxu0 %vm2014_vm3, %v2186_v24  ;;  %3500 = vmatpush3.bf16.msra.mxu1 %v2346_v3 }
 0x422   : > { %v3765_v48 = vpop.eup %3764  ;;  %2154 = vadd.xlane.f32.xlu1 %v2153_v46  ;;  %3501 = vmatprep.mubr.msk.bf16.mxu1 %vm3853_vm0, %v3852_v5 }
 0x423   : > { %v3767_v49 = vpop.eup %3766  ;;  %3511 = vmatprep.subr.bf16.mxu1 %v3852_v5  ;;  %3533 = vmatprep.mubr.msk.bf16.mxu0 %vm3853_vm0, %v3852_v5  ;;  %v2138_v12 = vsel %vm2014_vm3, %v3765_v48, 0.0 }
 0x424   : > { %v3769_v52 = vpop.eup %3768  ;;  %2133 = vadd.xlane.f32.xlu0 %v2132_v50  ;;  %v2162_v0 = vsel %vm2039_vm2, %v3767_v49, 0.0  ;;  %3530 = vmatpush3.bf16.msra.mxu0 %v3728_v58 }
 0x425   : > { %v3771_v57 = vpop.eup %3770  ;;  %v2187_v4 = vpack.c.bf16 %v3769_v52, %v3765_v48  ;;  %v2141_v14 = vsel %vm2014_vm3, %v3769_v52, 0.0  ;;  %3531 = vmatprep.subr.bf16.mxu0 %v3852_v5 }
 0x426   : > { %2136 = vadd.xlane.f32.xlu1 %v2135_v60  ;;  %v2195_v6 = vpack.c.bf16 %v3771_v57, %v3767_v49  ;;  %v2165_v54 = vsel %vm2039_vm2, %v3771_v57, 0.0  ;;  %v3732_v60 = vld [vmem:[%s4763_s8 + $0x20] sm:$0xff]  }
 0x428   : > { %3502 = vmatmul.mubr.msk.bf16.vlgmr.msra.gmra.mrb[52].mxu1 %vm2039_vm2, %v2195_v6  ;;  %2157 = vadd.xlane.f32.xlu0 %v2156_v9  ;;  %v3733_v9 = vld [vmem:[%s4763_s8 + $0x28] sm:$0xff]  }
 0x429   : > { %3512 = vmatpush3.bf16.msra.mxu1 %v2189_v59  ;;  %3513 = vmatprep.mubr.msk.bf16.mxu1 %vm3853_vm0, %v3852_v5  ;;  %v3729_v59 = vld [vmem:[%s4763_s8 + $0x8] sm:$0xff]  }
 0x42a   : > { %2160 = vadd.xlane.f32.xlu1 %v2159_v11  ;;  %3523 = vmatprep.subr.bf16.mxu1 %v3852_v5 }
 0x42b   : > { %3532 = vmatpush3.bf16.msra.mxu0 %v3729_v59 }
 0x42c   : > { %2139 = vadd.xlane.f32.xlu0 %v2138_v12  ;;  %3537 = vmatprep.subr.bf16.mxu0 %v3852_v5 }
 0x42e   : > { %2142 = vadd.xlane.f32.xlu1 %v2141_v14 }
 0x430   : > { %3514 = vmatmul.mubr.msk.bf16.vlgmr.msra.gmra.mrb[48].mxu1 %vm2014_vm3, %v2185_v61  ;;  %2163 = vadd.xlane.f32.xlu0 %v2162_v0 }
 0x431   : > { %3524 = vmatpush3.bf16.msra.mxu1 %v2191_v8  ;;  %3525 = vmatprep.mubr.msk.bf16.mxu1 %vm3853_vm0, %v3852_v5 }
 0x432   : > { %2166 = vadd.xlane.f32.xlu1 %v2165_v54 }
 0x438   : > { %3526 = vmatmul.mubr.msk.bf16.vlgmr.msra.gmra.mrb[52].mxu1 %vm2014_vm3, %v2187_v4 }
 0x479   : > { %v2122_v2 = vpop.xlane.xlu0 %2121 }
 0x47b   : > { %v2125_v7 = vpop.xlane.xlu1 %2124 }
 0x47d   : > { %v2146_v8 = vpop.xlane.xlu0 %2145 }
 0x47e   : > { %v2168_v37 = vadd.f32 %v2146_v8, %v2122_v2  ;;  %v3735_v8 = vld [vmem:[%s4763_s8 + $0x38] sm:$0xff]  }
 0x47f   : > { %v2149_v18 = vpop.xlane.xlu1 %2148 }
 0x480   : > { %v2169_v1 = vadd.f32 %v2149_v18, %v2125_v7  ;;  %3772 = vrcp.f32 %v2168_v37  ;;  %v3734_v7 = vld [vmem:[%s4763_s8 + $0x30] sm:$0xff]  }
 0x482   : > { %3774 = vrcp.f32 %v2169_v1 }
 0x48a   : > { %v3773_v30 = vpop.eup %3772 }
 0x48c   : > { %v3775_v26 = vpop.eup %3774 }
 0x4a9   : > { %v2128_v15 = vpop.xlane.xlu0 %2127 }
 0x4ab   : > { %v2131_v19 = vpop.xlane.xlu1 %2130 }
 0x4ad   : > { %v2152_v34 = vpop.xlane.xlu0 %2151 }
 0x4ae   : > { %v2170_v51 = vadd.f32 %v2152_v34, %v2128_v15 }
 0x4af   : > { %v2155_v21 = vpop.xlane.xlu1 %2154 }
 0x4b0   : > { %v2171_v45 = vadd.f32 %v2155_v21, %v2131_v19 }
 0x4b1   : > { %v2134_v16 = vpop.xlane.xlu0 %2133 }
 0x4b3   : > { %v2137_v17 = vpop.xlane.xlu1 %2136 }
 0x4b5   : > { %v2158_v22 = vpop.xlane.xlu0 %2157 }
 0x4b6   : > { %v2172_v25 = vadd.f32 %v2158_v22, %v2134_v16 }
 0x4b7   : > { %v2161_v24 = vpop.xlane.xlu1 %2160 }
 0x4b8   : > { %v2173_v27 = vadd.f32 %v2161_v24, %v2137_v17  ;;  %3776 = vrcp.f32 %v2172_v25 }
 0x4b9   : > { %v2140_v39 = vpop.xlane.xlu0 %2139 }
 0x4ba   : > { %3778 = vrcp.f32 %v2173_v27 }
 0x4bb   : > { %v2143_v53 = vpop.xlane.xlu1 %2142  ;;  %3780 = vrcp.f32 %v2170_v51 }
 0x4bc   : > { %3782 = vrcp.f32 %v2171_v45 }
 0x4bd   : > { %v2164_v33 = vpop.xlane.xlu0 %2163 }
 0x4be   : > { %v2174_v61 = vadd.f32 %v2164_v33, %v2140_v39 }
 0x4bf   : > { %v2167_v36 = vpop.xlane.xlu1 %2166 }
 0x4c0   : > { %v2175_v63 = vadd.f32 %v2167_v36, %v2143_v53  ;;  %3784 = vrcp.f32 %v2174_v61 }
 0x4c2   : > { %v3777_v23 = vpop.eup %3776  ;;  %3786 = vrcp.f32 %v2175_v63 }
 0x4c4   : > { %v3779_v43 = vpop.eup %3778 }
 0x4c5   : > { %v3781_v38 = vpop.eup %3780 }
 0x4c6   : > { %v3783_v48 = vpop.eup %3782 }
 0x4ca   : > { %v3785_v11 = vpop.eup %3784 }
 0x4cc   : > { %v3787_v14 = vpop.eup %3786 }
 0x4ec   : > { %v2426_v28 = vpop.f32.mrb[32].mxu0 }
 0x4ed   : > { %v3509_v31 = vpop.f32.mrb[33].mxu0  ;;  %v2565_v44 = vmul.f32 %v3773_v30, %v2426_v28 }
 0x4ee   : > { %v2429_v32 = vpop.f32.mrb[34].mxu0 }
 0x4ef   : > { %v2566_v35 = vmul.f32 %v3775_v26, %v2429_v32  ;;  %v3510_v20 = vpop.f32.mrb[35].mxu0 }
 0x4f1   : > { %v2573_v29 = vpack.c.bf16 %v2566_v35, %v2565_v44 }
 0x4f3   : > { %3534 = vmatmul.mubr.msk.bf16.vlgmr.msra.gmra.mrb[40].mxu0 %vm1645_vm1, %v2573_v29 }
 0x4f4   : > { %v2514_v47 = vpop.f32.mrb[36].mxu0  ;;  %3538 = vmatpush3.bf16.msra.mxu0 %v3730_v10  ;;  %3541 = vmatprep.mubr.msk.bf16.mxu0 %vm3853_vm0, %v3852_v5 }
 0x4f5   : > { %v3521_v41 = vpop.f32.mrb[37].mxu0  ;;  %3539 = vmatprep.subr.bf16.mxu0 %v3852_v5  ;;  %v2569_v40 = vmul.f32 %v3777_v23, %v2514_v47 }
 0x4f6   : > { %v2517_v55 = vpop.f32.mrb[38].mxu0 }
 0x4f7   : > { %v2570_v42 = vmul.f32 %v3779_v43, %v2517_v55  ;;  %v3522_v56 = vpop.f32.mrb[39].mxu0 }
 0x4f8   : > { %3540 = vmatpush3.bf16.msra.mxu0 %v3731_v13 }
 0x4f9   : > { %v2575_v62 = vpack.c.bf16 %v2570_v42, %v2569_v40  ;;  %3545 = vmatprep.subr.bf16.mxu0 %v3852_v5 }
 0x503   : > { %v2470_v3 = vpop.f32.mrb[48].mxu1 }
 0x504   : > { %v3515_v46 = vpop.f32.mrb[49].mxu1  ;;  %v2567_v50 = vmul.f32 %v3781_v38, %v2470_v3 }
 0x505   : > { %v2473_v49 = vpop.f32.mrb[50].mxu1 }
 0x506   : > { %v2568_v52 = vmul.f32 %v3783_v48, %v2473_v49  ;;  %v3516_v57 = vpop.f32.mrb[51].mxu1 }
 0x508   : > { %v2574_v4 = vpack.c.bf16 %v2568_v52, %v2567_v50 }
 0x50a   : > { %3542 = vmatmul.mubr.msk.bf16.vlgmr.msra.gmra.mrb[40].mxu0 %vm1645_vm1, %v2574_v4 }
 0x50b   : > { %v2558_v6 = vpop.f32.mrb[52].mxu1  ;;  %3546 = vmatpush3.bf16.msra.mxu0 %v3732_v60  ;;  %3549 = vmatprep.mubr.msk.bf16.mxu0 %vm3853_vm0, %v3852_v5 }
 0x50c   : > { %v3527_v12 = vpop.f32.mrb[53].mxu1  ;;  %3547 = vmatprep.subr.bf16.mxu0 %v3852_v5  ;;  %v2571_v54 = vmul.f32 %v3785_v11, %v2558_v6 }
 0x50d   : > { %v2561_v0 = vpop.f32.mrb[54].mxu1 }
 0x50e   : > { %v2572_v58 = vmul.f32 %v3787_v14, %v2561_v0  ;;  %v3528_v59 = vpop.f32.mrb[55].mxu1 }
 0x50f   : > { %3548 = vmatpush3.bf16.msra.mxu0 %v3733_v9 }
 0x510   : > { %v2576_v2 = vpack.c.bf16 %v2572_v58, %v2571_v54  ;;  %3553 = vmatprep.subr.bf16.mxu0 %v3852_v5 }
 0x516   : > { %3550 = vmatmul.mubr.msk.bf16.vlgmr.msra.gmra.mrb[40].mxu0 %vm1645_vm1, %v2575_v62 }
 0x517   : > { %3554 = vmatpush3.bf16.msra.mxu0 %v3734_v7  ;;  %3557 = vmatprep.mubr.msk.bf16.mxu0 %vm3853_vm0, %v3852_v5 }
 0x518   : > { %3555 = vmatprep.subr.bf16.mxu0 %v3852_v5 }
 0x51b   : > { %3556 = vmatpush3.bf16.msra.mxu0 %v3735_v8 }
 0x522   : > { %3558 = vmatmul.mubr.msk.bf16.vlgmr.msra.gmra.mrb[40].mxu0 %vm1645_vm1, %v2576_v2 }
 0x5f5   : > { %v2810_v18 = vpop.f32.mrb[40].mxu0 }
 0x5f6   : > { %2823 = vst [vmem:[%s325_s28] sm:$0xff] %v2810_v18  ;;  %v3559_v15 = vpop.f32.mrb[41].mxu0 }
 0x5f7   : > { %v2813_v5 = vpop.f32.mrb[42].mxu0 }
 0x5f8   : > { %2824 = vst [vmem:[%s325_s28 + $0x8] sm:$0xff] %v2813_v5  ;;  %v3560_v19 = vpop.f32.mrb[43].mxu0 }
 0x5f9   : > { %3801 = shalt.err (!%p3798_p3)
}
 0x5fa   : > { %s3802_s26 = scalar_lea.hbm %s4712_s21, 256  ;;  %s3806_s14 = scalar_lea.hbm %s4764_s9, 512 }
 0x5fb   : > { %p3803_p4 = scmp.ne.s32.totalorder %s4712_s21, %s3802_s26  ;;  %p3807_p9 = scmp.lt.u32.totalorder %s4712_s21, %s4764_s9 }
 0x5fc   : > { %p3808_p10 = scmp.lt.u32.totalorder %s3806_s14, %s3802_s26  ;;  %p3810_p12 = scmp.lt.u32.totalorder %s3802_s26, %s4712_s21 }
 0x5fd   : > { %p3804_p7 = pnand %p3803_p4, %p3945_p5 }
 0x5fe   : > { %p3809_p11 = por %p3808_p10, %p3807_p9 }
 0x5ff   : > { %p3805_p8 = pneg %p3804_p7 }
 0x600   : > { %p3811_p13 = por %p3810_p12, %p3809_p11 }
 0x602   : > { %p3812_p0 = pnand %p3811_p13, %p3805_p8 }
 0x604   : > { %3815 = shalt.err (!%p3812_p0)
}
 0x605   : > { %s3855_s23 = smov 128   ;;  %s3856_s13 = smov 8  }
 0x606   : > { %3589 = dma.vmem_to_hbm [thread:$0]  (%p3945_p5), %s4707_s29, 256, %s4712_s21, %s4714_s22, %s3855_s23, %s3855_s23, %s3856_s13  }
 0x607 PF: > { %p3595_p1 = scmp.ge.s32.totalorder %s3850_s12, 2  ;;  %s2854_s24 = sand.u32 1, %s3838_s30  }
 0x608   : > { %s2855_s25 = scalar_lea.sflag [#allocation3], %s2854_s24 }
 0x609   : > { %p3592_p2 = pnand %p3595_p1, %p3949_p6 }
 0x60b   : > { %3833 = dma.done.wait (!%p3592_p2), %s2855_s25, 256  }
 0x60c   : > { %3835 = vsyncadd (!%p3592_p2), %s2855_s25, 4294967040  ;;  %p19_p3 = scmp.ge.s32.totalorder %s3932_s15, 4   ;;  %s4767_s30 = smov %s3842_s10 }
 0x60d   : > { %s4768_s10 = smov %s3846_s11  ;;  %s4769_s11 = smov %s3943_s18 }
 0x60e   : > { %s4770_s12 = smov %s3932_s15  ;;  %21 = sbr.rel (!%p19_p3) target bundleno = 3 (0x3), region = 91 }
 0x615   :  { %2860 = vsyncpa [#allocation3], 1 }
 0x616   :  { %2862 = vsyncpa [#allocation3 + $0x1], 1 }

</bundles_post_ra>
